<compile_context>
chip_gen: v6e
topology: v6e:2x2x1
jax: 0.10.0
libtpu: 0.0.40
codegen_flags: <defaults>
</compile_context>

<pallas_src>
import math
import functools

import numpy as np
import jax
import jax.numpy as jnp
from jax.experimental import pallas as pl
from jax.experimental.pallas import tpu as pltpu

EPS = 1e-5
ROPE_THETA = 10000.0


# ---------------------------------------------------------------------------
# RoPE tables: canonical interleaved Llama RoPE expanded over `n_heads`
# concatenated heads so it can be applied to a raw [rows, n_heads*hd] slab in
# one lane-dense shot.  Cached so repeated decode steps don't rebuild tables.
# ---------------------------------------------------------------------------
@functools.lru_cache(maxsize=None)
def _rope_tables(start_pos, seq_len, n_heads, head_dim):
    half = head_dim // 2
    inv_freq = 1.0 / (ROPE_THETA ** (np.arange(half, dtype=np.float64) / half))
    pos = start_pos + np.arange(seq_len, dtype=np.float64)
    ang = pos[:, None] * inv_freq[None, :]                 # [S, hd/2]
    ang = np.repeat(ang, 2, axis=1)                        # [S, hd]   theta_j per pair
    ang = np.tile(ang, (1, n_heads))                       # [S, n_heads*hd]
    cos = np.cos(ang)
    sin = np.sin(ang)
    odd = (np.arange(n_heads * head_dim) % 2).astype(bool)[None, :]
    # out[2j]   = t[2j]*cos - t[2j+1]*sin  -> weight of roll(t,-1) is -sin on even lanes
    # out[2j+1] = t[2j+1]*cos + t[2j]*sin  -> weight of roll(t,+1) is +sin on odd  lanes
    sin_next = np.where(odd, 0.0, -sin)
    sin_prev = np.where(odd, sin, 0.0)
    return (cos.astype(np.float32),
            sin_next.astype(np.float32),
            sin_prev.astype(np.float32))


def _rope(t, cos, sin_next, sin_prev):
    # Interleaved RoPE over the full width.  The zeroed entries of sin_next/sin_prev
    # kill the circular wrap-around of the rolls, so this is exact.
    # TODO(synk): move the two jnp.rolls to pltpu.roll (XLU slot) once the rotation
    # direction convention is pinned down; elementwise cost is negligible vs matmuls.
    return (t * cos
            + jnp.roll(t, -1, axis=-1) * sin_next
            + jnp.roll(t, 1, axis=-1) * sin_prev)


# ---------------------------------------------------------------------------
# Fused kernel: one grid step == one batch element.
# ---------------------------------------------------------------------------
def _encoder_block_kernel(
    x_ref, xw_ref, hw_ref,
    wqkv_ref, wo_ref, w13_ref, w2_ref,
    cos_ref, sn_ref, sp_ref,
    ck_in_ref, cv_in_ref,
    y_ref, ck_out_ref, cv_out_ref,
    *, n_heads, n_kv_heads, head_dim, hidden_dim, start_pos,
):
    S, D = x_ref.shape
    H, KVH, hd = n_heads, n_kv_heads, head_dim
    n_rep = H // KVH
    T = start_pos + S                       # live cache length (static)
    QW = H * hd                             # q width
    KW = KVH * hd                           # k / v width

    x = x_ref[...]                          # [S, D] f32

    # ---- attention RMSNorm (f32 statistics; rsqrt -> EUP) ----
    xn = x * jax.lax.rsqrt(jnp.mean(x * x, axis=-1, keepdims=True) + EPS) * xw_ref[...]
    xn_b = xn.astype(jnp.bfloat16)

    # ---- fused q|k|v projection (single bf16 MXU matmul, f32 accumulate) ----
    qkv = jnp.dot(xn_b, wqkv_ref[...], preferred_element_type=jnp.float32)  # [S, QW+2*KW]

    # ---- RoPE applied once over the contiguous q|k region ----
    qk = _rope(qkv[:, :QW + KW], cos_ref[...], sn_ref[...], sp_ref[...])
    xq = qk[:, :QW]                          # [S, H*hd]   (1/sqrt(hd) folded into Wq)
    xk = qk[:, QW:QW + KW]                   # [S, KVH*hd]
    xv = qkv[:, QW + KW:]                    # [S, KVH*hd]

    # ---- KV-cache writeback (aliased outputs; only rows [0, T) are mapped) ----
    # TODO(synk): original module keeps the cache in fp16; kept in the caller dtype.
    if start_pos > 0:  # static python branch
        ck_out_ref[0:start_pos] = ck_in_ref[0:start_pos]
        cv_out_ref[0:start_pos] = cv_in_ref[0:start_pos]
    for kh in range(KVH):
        sl = slice(kh * hd, (kh + 1) * hd)
        ck_out_ref[start_pos:T, kh, :] = xk[:, sl].astype(ck_out_ref.dtype)
        cv_out_ref[start_pos:T, kh, :] = xv[:, sl].astype(cv_out_ref.dtype)

    # ---- head-batched GQA attention over the live prefix ----
    # Group the n_rep query heads of each KV head along rows: q_b [KVH, n_rep*S, hd].
    # K/V are built from the fresh rotated projections + the *input* cache prefix, so
    # attention does not depend on the cache writeback above.
    q_b = jnp.stack(
        [jnp.concatenate([xq[:, (kh * n_rep + r) * hd:(kh * n_rep + r + 1) * hd]
                          for r in range(n_rep)], axis=0)
         for kh in range(KVH)], axis=0)                             # [KVH, n_rep*S, hd]

    def _kv_head(new_full, prefix_ref, kh):
        new = new_full[:, kh * hd:(kh + 1) * hd]                    # [S, hd]
        if start_pos > 0:  # static python branch
            old = prefix_ref[0:start_pos, kh, :].astype(jnp.float32)
            return jnp.concatenate([old, new], axis=0)
        return new

    k_b = jnp.stack([_kv_head(xk, ck_in_ref, kh) for kh in range(KVH)], axis=0)  # [KVH,T,hd]
    v_b = jnp.stack([_kv_head(xv, cv_in_ref, kh) for kh in range(KVH)], axis=0)  # [KVH,T,hd]

    sc = jnp.einsum('hqd,hkd->hqk',
                    q_b.astype(jnp.bfloat16), k_b.astype(jnp.bfloat16),
                    preferred_element_type=jnp.float32)             # [KVH, n_rep*S, T]
    sc = sc - jnp.max(sc, axis=-1, keepdims=True)
    p = jnp.exp(sc)
    inv_l = pl.reciprocal(jnp.sum(p, axis=-1, keepdims=True), approx=True)
    o_b = jnp.einsum('hqk,hkd->hqd',
                     p.astype(jnp.bfloat16), v_b.astype(jnp.bfloat16),
                     preferred_element_type=jnp.float32)            # [KVH, n_rep*S, hd]
    o_b = o_b * inv_l                                               # normalise over hd lanes

    # back to [S, H*hd] with heads head-major on lanes, then output projection
    o_parts = [o_b[kh, r * S:(r + 1) * S, :]
               for kh in range(KVH) for r in range(n_rep)]
    attn = jnp.concatenate(o_parts, axis=-1)                        # [S, H*hd]
    attn = jnp.dot(attn.astype(jnp.bfloat16), wo_ref[...],
                   preferred_element_type=jnp.float32)              # [S, D]

    h = x + attn

    # ---- FFN RMSNorm + SwiGLU (fused w1|w3 matmul) ----
    hn = h * jax.lax.rsqrt(jnp.mean(h * h, axis=-1, keepdims=True) + EPS) * hw_ref[...]
    hn_b = hn.astype(jnp.bfloat16)
    ag = jnp.dot(hn_b, w13_ref[...], preferred_element_type=jnp.float32)   # [S, 2*hidden]
    a = ag[:, :hidden_dim]
    g = ag[:, hidden_dim:]
    swish = a * pl.reciprocal(1.0 + jnp.exp(-a), approx=True)              # SiLU via EUP
    f = jnp.dot((swish * g).astype(jnp.bfloat16), w2_ref[...],
                preferred_element_type=jnp.float32)                        # [S, D]

    y_ref[...] = h + f                       # lane-dense [S, D] slab store


# ---------------------------------------------------------------------------
# Wrapper.
# ---------------------------------------------------------------------------
def encoder_block_forward(x, params, cache_k, cache_v, start_pos,
                          *, n_heads, n_kv_heads):
    """Fused EncoderBlock forward. Returns (out[B,S,D], new_cache_k, new_cache_v)."""
    B, S, D = x.shape
    head_dim = D // n_heads
    start_pos = int(start_pos)
    T = start_pos + S
    max_seq = cache_k.shape[1]
    assert T <= max_seq
    hidden_dim = params['w1_t'].shape[1]

    # Weight prep (constant-foldable under jit): score scale folded into Wq,
    # q|k|v and w1|w3 fused, bf16 cast (halves weight DMA / VMEM footprint).
    scale = 1.0 / math.sqrt(head_dim)
    wqkv = jnp.concatenate(
        [params['wq_t'] * scale, params['wk_t'], params['wv_t']], axis=1
    ).astype(jnp.bfloat16)                                       # [D, (H+2*KVH)*hd]
    wo = params['wo_t'].astype(jnp.bfloat16)                     # [H*hd, D]
    w13 = jnp.concatenate([params['w1_t'], params['w3_t']], axis=1
                          ).astype(jnp.bfloat16)                 # [D, 2*hidden]
    w2 = params['w2_t'].astype(jnp.bfloat16)                     # [hidden, D]
    xw = params['x_rms'].reshape(1, D).astype(jnp.float32)
    hw = params['h_rms'].reshape(1, D).astype(jnp.float32)

    # One table set covering the concatenated q|k region of the fused projection.
    ct, sn, sp = _rope_tables(start_pos, S, n_heads + n_kv_heads, head_dim)
    cos_t, sn_t, sp_t = jnp.asarray(ct), jnp.asarray(sn), jnp.asarray(sp)

    kernel = functools.partial(
        _encoder_block_kernel,
        n_heads=n_heads, n_kv_heads=n_kv_heads,
        head_dim=head_dim, hidden_dim=hidden_dim, start_pos=start_pos)

    def _const2(b):
        return (0, 0)

    # Only the live [0, T) prefix of the caches is mapped; rows >= T are never DMA'd
    # and are preserved in HBM because the caches are aliased in/out.
    cache_spec = pl.BlockSpec((None, T, n_kv_heads, head_dim), lambda b: (b, 0, 0, 0))

    args = (x, xw, hw, wqkv, wo, w13, w2, cos_t, sn_t, sp_t, cache_k, cache_v)
    in_specs = [
        pl.BlockSpec((None, S, D), lambda b: (b, 0, 0)),        # x (per-batch block)
        pl.BlockSpec((1, D), _const2),                          # x_rms
        pl.BlockSpec((1, D), _const2),                          # h_rms
        pl.BlockSpec(wqkv.shape, _const2),                      # weights stay resident
        pl.BlockSpec(wo.shape, _const2),
        pl.BlockSpec(w13.shape, _const2),
        pl.BlockSpec(w2.shape, _const2),
        pl.BlockSpec(cos_t.shape, _const2),                     # RoPE tables
        pl.BlockSpec(sn_t.shape, _const2),
        pl.BlockSpec(sp_t.shape, _const2),
        cache_spec,                                             # cache_k (aliased -> out 1)
        cache_spec,                                             # cache_v (aliased -> out 2)
    ]
    out_specs = [
        pl.BlockSpec((S, D), lambda b: (b, 0)),                 # out as a [B*S, D] slab
        cache_spec,
        cache_spec,
    ]
    out_shape = (
        jax.ShapeDtypeStruct((B * S, D), jnp.float32),
        jax.ShapeDtypeStruct(cache_k.shape, cache_k.dtype),
        jax.ShapeDtypeStruct(cache_v.shape, cache_v.dtype),
    )

    y, ck_new, cv_new = pl.pallas_call(
        kernel,
        grid=(B,),
        in_specs=in_specs,
        out_specs=out_specs,
        out_shape=out_shape,
        input_output_aliases={10: 1, 11: 2},      # caches updated in place
        compiler_params=pltpu.CompilerParams(
            dimension_semantics=("parallel",),    # batch shards across cores on v7x
            vmem_limit_bytes=32 * 1024 * 1024),
    )(*args)
    return y.reshape(B, S, D), ck_new, cv_new


# ---------------------------------------------------------------------------
# Plain-JAX f32 reference (mirrors the PyTorch module; interleaved RoPE).
# ---------------------------------------------------------------------------
def encoder_block_reference(x, params, cache_k, cache_v, start_pos,
                            *, n_heads, n_kv_heads):
    B, S, D = x.shape
    head_dim = D // n_heads
    n_rep = n_heads // n_kv_heads
    half = head_dim // 2

    def rms(t, w):
        return t * jax.lax.rsqrt(jnp.mean(t * t, -1, keepdims=True) + EPS) * w

    def rope_interleaved(t):              # t: [B, S, nh, hd]
        inv_freq = 1.0 / (ROPE_THETA ** (jnp.arange(half, dtype=jnp.float32) / half))
        pos = (start_pos + jnp.arange(S)).astype(jnp.float32)
        ang = pos[:, None] * inv_freq[None, :]
        cos = jnp.cos(ang)[None, :, None, :]
        sin = jnp.sin(ang)[None, :, None, :]
        tr = t.reshape(*t.shape[:-1], half, 2)
        te, to = tr[..., 0], tr[..., 1]
        return jnp.stack([te * cos - to * sin, te * sin + to * cos],
                         axis=-1).reshape(t.shape)

    xn = rms(x, params['x_rms'])
    xq = (xn @ params['wq_t']).reshape(B, S, n_heads, head_dim)
    xk = (xn @ params['wk_t']).reshape(B, S, n_kv_heads, head_dim)
    xv = (xn @ params['wv_t']).reshape(B, S, n_kv_heads, head_dim)
    xq = rope_interleaved(xq)
    xk = rope_interleaved(xk)
    ck = cache_k.at[:, start_pos:start_pos + S].set(xk)
    cv = cache_v.at[:, start_pos:start_pos + S].set(xv)
    keys = jnp.repeat(ck[:, :start_pos + S], n_rep, axis=2)
    values = jnp.repeat(cv[:, :start_pos + S], n_rep, axis=2)
    q = xq.transpose(0, 2, 1, 3)
    k = keys.transpose(0, 2, 1, 3)
    v = values.transpose(0, 2, 1, 3)
    sc = jnp.einsum('bhqd,bhkd->bhqk', q, k) / math.sqrt(head_dim)
    sc = jax.nn.softmax(sc, axis=-1)
    o = jnp.einsum('bhqk,bhkd->bhqd', sc, v).transpose(0, 2, 1, 3)
    attn = o.reshape(B, S, n_heads * head_dim) @ params['wo_t']
    h = x + attn
    hn = rms(h, params['h_rms'])
    a = hn @ params['w1_t']
    f = (a * jax.nn.sigmoid(a) * (hn @ params['w3_t'])) @ params['w2_t']
    return h + f, ck, cv


if __name__ == "__main__":
    # Small ModelArgs-consistent config: dim=64, n_heads=4, n_kv_heads=2,
    # multiple_of=32 -> hidden=192, max_seq_len=16; batch=2, seq=8.
    B, S = 2, 8
    dim, n_heads, n_kv_heads = 64, 4, 2
    head_dim = dim // n_heads
    multiple_of = 32
    max_seq_len = 16
    hidden = 4 * dim
    hidden = int(2 * hidden / 3)
    hidden = multiple_of * ((hidden + multiple_of - 1) // multiple_of)   # 192

    key = jax.random.PRNGKey(0)
    ks = jax.random.split(key, 8)
    w_scale = 0.05
    params = {
        'x_rms': jnp.ones((dim,), jnp.float32),
        'h_rms': jnp.ones((dim,), jnp.float32),
        'wq_t': w_scale * jax.random.normal(ks[0], (dim, n_heads * head_dim), jnp.float32),
        'wk_t': w_scale * jax.random.normal(ks[1], (dim, n_kv_heads * head_dim), jnp.float32),
        'wv_t': w_scale * jax.random.normal(ks[2], (dim, n_kv_heads * head_dim), jnp.float32),
        'wo_t': w_scale * jax.random.normal(ks[3], (n_heads * head_dim, dim), jnp.float32),
        'w1_t': w_scale * jax.random.normal(ks[4], (dim, hidden), jnp.float32),
        'w2_t': w_scale * jax.random.normal(ks[5], (hidden, dim), jnp.float32),
        'w3_t': w_scale * jax.random.normal(ks[6], (dim, hidden), jnp.float32),
    }
    x = jax.random.normal(ks[7], (B, S, dim), jnp.float32)

    # TODO(synk): cache kept in f32 (original module uses an fp16 CUDA cache).
    cache_k = jnp.zeros((B, max_seq_len, n_kv_heads, head_dim), jnp.float32)
    cache_v = jnp.zeros((B, max_seq_len, n_kv_heads, head_dim), jnp.float32)

    start_pos = 0
    T = start_pos + S

    # Golden f32 reference FIRST (the kernel donates / aliases the cache buffers).
    ref_out, ref_ck, ref_cv = encoder_block_reference(
        x, params, cache_k, cache_v, start_pos,
        n_heads=n_heads, n_kv_heads=n_kv_heads)
    ref_out = jax.block_until_ready(ref_out)

    fwd = jax.jit(
        functools.partial(encoder_block_forward,
                          n_heads=n_heads, n_kv_heads=n_kv_heads),
        static_argnums=(4,), donate_argnums=(2, 3))
    out, ck_new, cv_new = fwd(x, params, cache_k, cache_v, start_pos)
    jax.block_until_ready((out, ck_new, cv_new))

    # bf16 MXU inputs + approx-reciprocal EUP paths vs. the exact f32 reference.
    tol = 3e-2
    err = float(jnp.max(jnp.abs(out - ref_out)))
    err_k = float(jnp.max(jnp.abs(ck_new[:, :T] - ref_ck[:, :T])))
    err_v = float(jnp.max(jnp.abs(cv_new[:, :T] - ref_cv[:, :T])))
    assert err < tol, f"out max abs err {err}"
    assert err_k < tol, f"cache_k max abs err {err_k}"
    assert err_v < tol, f"cache_v max abs err {err_v}"
    print("KERNEL_OK")
</pallas_src>

<mosaic_0001>
module attributes {stable_mosaic.version = 11 : i64} {
  func.func @_encoder_block_kernel(%arg0: i32, %arg1: memref<1x8x64xf32, #tpu.memory_space<vmem>>, %arg2: memref<1x64xf32, #tpu.memory_space<vmem>>, %arg3: memref<1x64xf32, #tpu.memory_space<vmem>>, %arg4: memref<64x128xbf16, #tpu.memory_space<vmem>>, %arg5: memref<64x64xbf16, #tpu.memory_space<vmem>>, %arg6: memref<64x384xbf16, #tpu.memory_space<vmem>>, %arg7: memref<192x64xbf16, #tpu.memory_space<vmem>>, %arg8: memref<8x96xf32, #tpu.memory_space<vmem>>, %arg9: memref<8x96xf32, #tpu.memory_space<vmem>>, %arg10: memref<8x96xf32, #tpu.memory_space<vmem>>, %arg11: memref<1x8x2x16xf32, #tpu.memory_space<vmem>>, %arg12: memref<1x8x2x16xf32, #tpu.memory_space<vmem>>, %arg13: memref<8x64xf32, #tpu.memory_space<vmem>>, %arg14: memref<1x8x2x16xf32, #tpu.memory_space<vmem>>, %arg15: memref<1x8x2x16xf32, #tpu.memory_space<vmem>>) attributes {dimension_semantics = [#tpu.dimension_semantics<parallel>], iteration_bounds = array<i64: 2>, scalar_prefetch = 0 : i64, scratch_operands = 0 : i64, tpu.core_type = #tpu.core_type<tc>, window_params = [{transform_indices = @transform_0, window_bounds = array<i64: 1, 8, 64>}, {pipeline_mode = #tpu.pipeline_mode<synchronous>, transform_indices = @transform_1, window_bounds = array<i64: 1, 64>}, {pipeline_mode = #tpu.pipeline_mode<synchronous>, transform_indices = @transform_2, window_bounds = array<i64: 1, 64>}, {pipeline_mode = #tpu.pipeline_mode<synchronous>, transform_indices = @transform_3, window_bounds = array<i64: 64, 128>}, {pipeline_mode = #tpu.pipeline_mode<synchronous>, transform_indices = @transform_4, window_bounds = array<i64: 64, 64>}, {pipeline_mode = #tpu.pipeline_mode<synchronous>, transform_indices = @transform_5, window_bounds = array<i64: 64, 384>}, {pipeline_mode = #tpu.pipeline_mode<synchronous>, transform_indices = @transform_6, window_bounds = array<i64: 192, 64>}, {pipeline_mode = #tpu.pipeline_mode<synchronous>, transform_indices = @transform_7, window_bounds = array<i64: 8, 96>}, {pipeline_mode = #tpu.pipeline_mode<synchronous>, transform_indices = @transform_8, window_bounds = array<i64: 8, 96>}, {pipeline_mode = #tpu.pipeline_mode<synchronous>, transform_indices = @transform_9, window_bounds = array<i64: 8, 96>}, {transform_indices = @transform_10, window_bounds = array<i64: 1, 8, 2, 16>}, {transform_indices = @transform_11, window_bounds = array<i64: 1, 8, 2, 16>}, {transform_indices = @transform_12, window_bounds = array<i64: 8, 64>}, {transform_indices = @transform_13, window_bounds = array<i64: 1, 8, 2, 16>}, {transform_indices = @transform_14, window_bounds = array<i64: 1, 8, 2, 16>}]} {
    %c0 = arith.constant 0 : index
    %c0_0 = arith.constant 0 : index
    %c0_1 = arith.constant 0 : index
    %0 = vector.load %arg1[%c0, %c0_0, %c0_1] : memref<1x8x64xf32, #tpu.memory_space<vmem>>, vector<1x8x64xf32>
    %1 = vector.shape_cast %0 : vector<1x8x64xf32> to vector<8x64xf32>
    %2 = arith.mulf %1, %1 : vector<8x64xf32>
    %cst = arith.constant dense<0.000000e+00> : vector<8xf32>
    %3 = vector.multi_reduction <add>, %2, %cst [1] : vector<8x64xf32> to vector<8xf32>
    %4 = vector.shape_cast %3 : vector<8xf32> to vector<8x1xf32>
    %cst_2 = arith.constant 6.400000e+01 : f32
    %5 = vector.broadcast %cst_2 : f32 to vector<8x1xf32>
    %6 = arith.divf %4, %5 : vector<8x1xf32>
    %cst_3 = arith.constant 9.99999974E-6 : f32
    %7 = vector.broadcast %cst_3 : f32 to vector<8x1xf32>
    %8 = arith.addf %6, %7 : vector<8x1xf32>
    %9 = math.rsqrt %8 : vector<8x1xf32>
    %10 = vector.broadcast %9 : vector<8x1xf32> to vector<8x64xf32>
    %11 = arith.mulf %1, %10 : vector<8x64xf32>
    %c0_4 = arith.constant 0 : index
    %c0_5 = arith.constant 0 : index
    %12 = vector.load %arg2[%c0_4, %c0_5] : memref<1x64xf32, #tpu.memory_space<vmem>>, vector<1x64xf32>
    %13 = vector.broadcast %12 : vector<1x64xf32> to vector<8x64xf32>
    %14 = arith.mulf %11, %13 : vector<8x64xf32>
    %15 = arith.truncf %14 : vector<8x64xf32> to vector<8x64xbf16>
    %c0_6 = arith.constant 0 : index
    %c0_7 = arith.constant 0 : index
    %16 = vector.load %arg4[%c0_6, %c0_7] : memref<64x128xbf16, #tpu.memory_space<vmem>>, vector<64x128xbf16>
    %cst_8 = arith.constant dense<0.000000e+00> : vector<8x128xf32>
    %17 = tpu.matmul %15, %16, %cst_8 {dimension_numbers = #tpu.dot_dimension_numbers<[1], [0], [0], [1], [0, 0, 1, 1], [], []>} : vector<8x64xbf16>, vector<64x128xbf16>, vector<8x128xf32> -> vector<8x128xf32>
    %18 = vector.extract_strided_slice %17 {offsets = [0, 0], sizes = [8, 96], strides = [1, 1]} : vector<8x128xf32> to vector<8x96xf32>
    %c0_9 = arith.constant 0 : index
    %c0_10 = arith.constant 0 : index
    %19 = vector.load %arg8[%c0_9, %c0_10] : memref<8x96xf32, #tpu.memory_space<vmem>>, vector<8x96xf32>
    %c0_11 = arith.constant 0 : index
    %c0_12 = arith.constant 0 : index
    %20 = vector.load %arg9[%c0_11, %c0_12] : memref<8x96xf32, #tpu.memory_space<vmem>>, vector<8x96xf32>
    %c0_13 = arith.constant 0 : index
    %c0_14 = arith.constant 0 : index
    %21 = vector.load %arg10[%c0_13, %c0_14] : memref<8x96xf32, #tpu.memory_space<vmem>>, vector<8x96xf32>
    %22 = arith.mulf %18, %19 : vector<8x96xf32>
    %23 = vector.extract_strided_slice %18 {offsets = [0, 1], sizes = [8, 95], strides = [1, 1]} : vector<8x96xf32> to vector<8x95xf32>
    %24 = vector.extract_strided_slice %18 {offsets = [0, 0], sizes = [8, 1], strides = [1, 1]} : vector<8x96xf32> to vector<8x1xf32>
    %25 = tpu.concatenate %23, %24 in 1 : vector<8x95xf32>, vector<8x1xf32> -> vector<8x96xf32>
    %26 = arith.mulf %25, %20 : vector<8x96xf32>
    %27 = arith.addf %22, %26 : vector<8x96xf32>
    %28 = vector.extract_strided_slice %18 {offsets = [0, 95], sizes = [8, 1], strides = [1, 1]} : vector<8x96xf32> to vector<8x1xf32>
    %29 = vector.extract_strided_slice %18 {offsets = [0, 0], sizes = [8, 95], strides = [1, 1]} : vector<8x96xf32> to vector<8x95xf32>
    %30 = tpu.concatenate %28, %29 in 1 : vector<8x1xf32>, vector<8x95xf32> -> vector<8x96xf32>
    %31 = arith.mulf %30, %21 : vector<8x96xf32>
    %32 = arith.addf %27, %31 : vector<8x96xf32>
    %33 = vector.extract_strided_slice %32 {offsets = [0, 0], sizes = [8, 64], strides = [1, 1]} : vector<8x96xf32> to vector<8x64xf32>
    %34 = vector.extract_strided_slice %32 {offsets = [0, 64], sizes = [8, 32], strides = [1, 1]} : vector<8x96xf32> to vector<8x32xf32>
    %35 = vector.extract_strided_slice %17 {offsets = [0, 96], sizes = [8, 32], strides = [1, 1]} : vector<8x128xf32> to vector<8x32xf32>
    %36 = vector.extract_strided_slice %34 {offsets = [0, 0], sizes = [8, 16], strides = [1, 1]} : vector<8x32xf32> to vector<8x16xf32>
    %c0_15 = arith.constant 0 : index
    %c0_16 = arith.constant 0 : index
    %c0_17 = arith.constant 0 : index
    %c0_18 = arith.constant 0 : index
    %37 = vector.load %arg14[%c0_15, %c0_16, %c0_17, %c0_18] : memref<1x8x2x16xf32, #tpu.memory_space<vmem>>, vector<1x8x1x16xf32>
    %38 = vector.shape_cast %37 : vector<1x8x1x16xf32> to vector<8x16xf32>
    %39 = vector.shape_cast %36 : vector<8x16xf32> to vector<1x8x1x16xf32>
    tpu.vector_store %arg14[%c0_15, %c0_16, %c0_17, %c0_18], %39 {strides = array<i32>} : memref<1x8x2x16xf32, #tpu.memory_space<vmem>>, vector<1x8x1x16xf32>,
    %40 = vector.extract_strided_slice %35 {offsets = [0, 0], sizes = [8, 16], strides = [1, 1]} : vector<8x32xf32> to vector<8x16xf32>
    %c0_19 = arith.constant 0 : index
    %c0_20 = arith.constant 0 : index
    %c0_21 = arith.constant 0 : index
    %c0_22 = arith.constant 0 : index
    %41 = vector.load %arg15[%c0_19, %c0_20, %c0_21, %c0_22] : memref<1x8x2x16xf32, #tpu.memory_space<vmem>>, vector<1x8x1x16xf32>
    %42 = vector.shape_cast %41 : vector<1x8x1x16xf32> to vector<8x16xf32>
    %43 = vector.shape_cast %40 : vector<8x16xf32> to vector<1x8x1x16xf32>
    tpu.vector_store %arg15[%c0_19, %c0_20, %c0_21, %c0_22], %43 {strides = array<i32>} : memref<1x8x2x16xf32, #tpu.memory_space<vmem>>, vector<1x8x1x16xf32>,
    %44 = vector.extract_strided_slice %34 {offsets = [0, 16], sizes = [8, 16], strides = [1, 1]} : vector<8x32xf32> to vector<8x16xf32>
    %c0_23 = arith.constant 0 : index
    %c0_24 = arith.constant 0 : index
    %c1 = arith.constant 1 : index
    %c0_25 = arith.constant 0 : index
    %45 = vector.load %arg14[%c0_23, %c0_24, %c1, %c0_25] : memref<1x8x2x16xf32, #tpu.memory_space<vmem>>, vector<1x8x1x16xf32>
    %46 = vector.shape_cast %45 : vector<1x8x1x16xf32> to vector<8x16xf32>
    %47 = vector.shape_cast %44 : vector<8x16xf32> to vector<1x8x1x16xf32>
    tpu.vector_store %arg14[%c0_23, %c0_24, %c1, %c0_25], %47 {strides = array<i32>} : memref<1x8x2x16xf32, #tpu.memory_space<vmem>>, vector<1x8x1x16xf32>,
    %48 = vector.extract_strided_slice %35 {offsets = [0, 16], sizes = [8, 16], strides = [1, 1]} : vector<8x32xf32> to vector<8x16xf32>
    %c0_26 = arith.constant 0 : index
    %c0_27 = arith.constant 0 : index
    %c1_28 = arith.constant 1 : index
    %c0_29 = arith.constant 0 : index
    %49 = vector.load %arg15[%c0_26, %c0_27, %c1_28, %c0_29] : memref<1x8x2x16xf32, #tpu.memory_space<vmem>>, vector<1x8x1x16xf32>
    %50 = vector.shape_cast %49 : vector<1x8x1x16xf32> to vector<8x16xf32>
    %51 = vector.shape_cast %48 : vector<8x16xf32> to vector<1x8x1x16xf32>
    tpu.vector_store %arg15[%c0_26, %c0_27, %c1_28, %c0_29], %51 {strides = array<i32>} : memref<1x8x2x16xf32, #tpu.memory_space<vmem>>, vector<1x8x1x16xf32>,
    %52 = vector.extract_strided_slice %33 {offsets = [0, 0], sizes = [8, 16], strides = [1, 1]} : vector<8x64xf32> to vector<8x16xf32>
    %53 = vector.extract_strided_slice %33 {offsets = [0, 16], sizes = [8, 16], strides = [1, 1]} : vector<8x64xf32> to vector<8x16xf32>
    %54 = tpu.concatenate %52, %53 in 0 : vector<8x16xf32>, vector<8x16xf32> -> vector<16x16xf32>
    %55 = vector.extract_strided_slice %33 {offsets = [0, 32], sizes = [8, 16], strides = [1, 1]} : vector<8x64xf32> to vector<8x16xf32>
    %56 = vector.extract_strided_slice %33 {offsets = [0, 48], sizes = [8, 16], strides = [1, 1]} : vector<8x64xf32> to vector<8x16xf32>
    %57 = tpu.concatenate %55, %56 in 0 : vector<8x16xf32>, vector<8x16xf32> -> vector<16x16xf32>
    %58 = vector.shape_cast %54 : vector<16x16xf32> to vector<1x16x16xf32>
    %59 = vector.shape_cast %57 : vector<16x16xf32> to vector<1x16x16xf32>
    %60 = tpu.concatenate %58, %59 in 0 : vector<1x16x16xf32>, vector<1x16x16xf32> -> vector<2x16x16xf32>
    %61 = vector.extract_strided_slice %34 {offsets = [0, 0], sizes = [8, 16], strides = [1, 1]} : vector<8x32xf32> to vector<8x16xf32>
    %62 = vector.extract_strided_slice %34 {offsets = [0, 16], sizes = [8, 16], strides = [1, 1]} : vector<8x32xf32> to vector<8x16xf32>
    %63 = vector.shape_cast %61 : vector<8x16xf32> to vector<1x8x16xf32>
    %64 = vector.shape_cast %62 : vector<8x16xf32> to vector<1x8x16xf32>
    %65 = tpu.concatenate %63, %64 in 0 : vector<1x8x16xf32>, vector<1x8x16xf32> -> vector<2x8x16xf32>
    %66 = vector.extract_strided_slice %35 {offsets = [0, 0], sizes = [8, 16], strides = [1, 1]} : vector<8x32xf32> to vector<8x16xf32>
    %67 = vector.extract_strided_slice %35 {offsets = [0, 16], sizes = [8, 16], strides = [1, 1]} : vector<8x32xf32> to vector<8x16xf32>
    %68 = vector.shape_cast %66 : vector<8x16xf32> to vector<1x8x16xf32>
    %69 = vector.shape_cast %67 : vector<8x16xf32> to vector<1x8x16xf32>
    %70 = tpu.concatenate %68, %69 in 0 : vector<1x8x16xf32>, vector<1x8x16xf32> -> vector<2x8x16xf32>
    %71 = arith.truncf %60 : vector<2x16x16xf32> to vector<2x16x16xbf16>
    %72 = arith.truncf %65 : vector<2x8x16xf32> to vector<2x8x16xbf16>
    "tpu.trace_start"() <{level = 10 : i32, message = "hqd,hkd->hqk"}> : () -> ()
    %cst_30 = arith.constant dense<0.000000e+00> : vector<2x16x8xf32>
    %73 = tpu.matmul %71, %72, %cst_30 {dimension_numbers = #tpu.dot_dimension_numbers<[2], [2], [1], [1], [0, 0, 0, 1, 1, 1], [0], [0]>} : vector<2x16x16xbf16>, vector<2x8x16xbf16>, vector<2x16x8xf32> -> vector<2x16x8xf32>
    "tpu.trace_stop"() : () -> ()
    %cst_31 = arith.constant dense<0xFF800000> : vector<2x16xf32>
    %74 = vector.multi_reduction <maximumf>, %73, %cst_31 [2] : vector<2x16x8xf32> to vector<2x16xf32>
    %75 = vector.shape_cast %74 : vector<2x16xf32> to vector<2x16x1xf32>
    %76 = vector.broadcast %75 : vector<2x16x1xf32> to vector<2x16x8xf32>
    %77 = arith.subf %73, %76 : vector<2x16x8xf32>
    %78 = math.exp %77 : vector<2x16x8xf32>
    %cst_32 = arith.constant dense<0.000000e+00> : vector<2x16xf32>
    %79 = vector.multi_reduction <add>, %78, %cst_32 [2] : vector<2x16x8xf32> to vector<2x16xf32>
    %80 = vector.shape_cast %79 : vector<2x16xf32> to vector<2x16x1xf32>
    %81 = tpu.reciprocal %80 {approx = true} : vector<2x16x1xf32> -> vector<2x16x1xf32>
    %82 = arith.truncf %78 : vector<2x16x8xf32> to vector<2x16x8xbf16>
    %83 = arith.truncf %70 : vector<2x8x16xf32> to vector<2x8x16xbf16>
    "tpu.trace_start"() <{level = 10 : i32, message = "hqk,hkd->hqd"}> : () -> ()
    %cst_33 = arith.constant dense<0.000000e+00> : vector<2x16x16xf32>
    %84 = tpu.matmul %82, %83, %cst_33 {dimension_numbers = #tpu.dot_dimension_numbers<[2], [1], [1], [2], [0, 0, 0, 1, 1, 2], [0], [0]>} : vector<2x16x8xbf16>, vector<2x8x16xbf16>, vector<2x16x16xf32> -> vector<2x16x16xf32>
    "tpu.trace_stop"() : () -> ()
    %85 = vector.broadcast %81 : vector<2x16x1xf32> to vector<2x16x16xf32>
    %86 = arith.mulf %84, %85 : vector<2x16x16xf32>
    %87 = vector.extract_strided_slice %86 {offsets = [0, 0, 0], sizes = [1, 8, 16], strides = [1, 1, 1]} : vector<2x16x16xf32> to vector<1x8x16xf32>
    %88 = vector.shape_cast %87 : vector<1x8x16xf32> to vector<8x16xf32>
    %89 = vector.extract_strided_slice %86 {offsets = [0, 8, 0], sizes = [1, 8, 16], strides = [1, 1, 1]} : vector<2x16x16xf32> to vector<1x8x16xf32>
    %90 = vector.shape_cast %89 : vector<1x8x16xf32> to vector<8x16xf32>
    %91 = vector.extract_strided_slice %86 {offsets = [1, 0, 0], sizes = [1, 8, 16], strides = [1, 1, 1]} : vector<2x16x16xf32> to vector<1x8x16xf32>
    %92 = vector.shape_cast %91 : vector<1x8x16xf32> to vector<8x16xf32>
    %93 = vector.extract_strided_slice %86 {offsets = [1, 8, 0], sizes = [1, 8, 16], strides = [1, 1, 1]} : vector<2x16x16xf32> to vector<1x8x16xf32>
    %94 = vector.shape_cast %93 : vector<1x8x16xf32> to vector<8x16xf32>
    %95 = tpu.concatenate %88, %90, %92, %94 in 1 : vector<8x16xf32>, vector<8x16xf32>, vector<8x16xf32>, vector<8x16xf32> -> vector<8x64xf32>
    %96 = arith.truncf %95 : vector<8x64xf32> to vector<8x64xbf16>
    %c0_34 = arith.constant 0 : index
    %c0_35 = arith.constant 0 : index
    %97 = vector.load %arg5[%c0_34, %c0_35] : memref<64x64xbf16, #tpu.memory_space<vmem>>, vector<64x64xbf16>
    %cst_36 = arith.constant dense<0.000000e+00> : vector<8x64xf32>
    %98 = tpu.matmul %96, %97, %cst_36 {dimension_numbers = #tpu.dot_dimension_numbers<[1], [0], [0], [1], [0, 0, 1, 1], [], []>} : vector<8x64xbf16>, vector<64x64xbf16>, vector<8x64xf32> -> vector<8x64xf32>
    %99 = arith.addf %1, %98 : vector<8x64xf32>
    %100 = arith.mulf %99, %99 : vector<8x64xf32>
    %cst_37 = arith.constant dense<0.000000e+00> : vector<8xf32>
    %101 = vector.multi_reduction <add>, %100, %cst_37 [1] : vector<8x64xf32> to vector<8xf32>
    %102 = vector.shape_cast %101 : vector<8xf32> to vector<8x1xf32>
    %cst_38 = arith.constant 6.400000e+01 : f32
    %103 = vector.broadcast %cst_38 : f32 to vector<8x1xf32>
    %104 = arith.divf %102, %103 : vector<8x1xf32>
    %cst_39 = arith.constant 9.99999974E-6 : f32
    %105 = vector.broadcast %cst_39 : f32 to vector<8x1xf32>
    %106 = arith.addf %104, %105 : vector<8x1xf32>
    %107 = math.rsqrt %106 : vector<8x1xf32>
    %108 = vector.broadcast %107 : vector<8x1xf32> to vector<8x64xf32>
    %109 = arith.mulf %99, %108 : vector<8x64xf32>
    %c0_40 = arith.constant 0 : index
    %c0_41 = arith.constant 0 : index
    %110 = vector.load %arg3[%c0_40, %c0_41] : memref<1x64xf32, #tpu.memory_space<vmem>>, vector<1x64xf32>
    %111 = vector.broadcast %110 : vector<1x64xf32> to vector<8x64xf32>
    %112 = arith.mulf %109, %111 : vector<8x64xf32>
    %113 = arith.truncf %112 : vector<8x64xf32> to vector<8x64xbf16>
    %c0_42 = arith.constant 0 : index
    %c0_43 = arith.constant 0 : index
    %114 = vector.load %arg6[%c0_42, %c0_43] : memref<64x384xbf16, #tpu.memory_space<vmem>>, vector<64x384xbf16>
    %cst_44 = arith.constant dense<0.000000e+00> : vector<8x384xf32>
    %115 = tpu.matmul %113, %114, %cst_44 {dimension_numbers = #tpu.dot_dimension_numbers<[1], [0], [0], [1], [0, 0, 1, 1], [], []>} : vector<8x64xbf16>, vector<64x384xbf16>, vector<8x384xf32> -> vector<8x384xf32>
    %116 = vector.extract_strided_slice %115 {offsets = [0, 0], sizes = [8, 192], strides = [1, 1]} : vector<8x384xf32> to vector<8x192xf32>
    %117 = vector.extract_strided_slice %115 {offsets = [0, 192], sizes = [8, 192], strides = [1, 1]} : vector<8x384xf32> to vector<8x192xf32>
    %cst_45 = arith.constant 0.000000e+00 : f32
    %118 = vector.broadcast %cst_45 : f32 to vector<8x192xf32>
    %119 = arith.subf %118, %116 : vector<8x192xf32>
    %120 = math.exp %119 : vector<8x192xf32>
    %cst_46 = arith.constant 1.000000e+00 : f32
    %121 = vector.broadcast %cst_46 : f32 to vector<8x192xf32>
    %122 = arith.addf %121, %120 : vector<8x192xf32>
    %123 = tpu.reciprocal %122 {approx = true} : vector<8x192xf32> -> vector<8x192xf32>
    %124 = arith.mulf %116, %123 : vector<8x192xf32>
    %125 = arith.mulf %124, %117 : vector<8x192xf32>
    %126 = arith.truncf %125 : vector<8x192xf32> to vector<8x192xbf16>
    %c0_47 = arith.constant 0 : index
    %c0_48 = arith.constant 0 : index
    %127 = vector.load %arg7[%c0_47, %c0_48] : memref<192x64xbf16, #tpu.memory_space<vmem>>, vector<192x64xbf16>
    %cst_49 = arith.constant dense<0.000000e+00> : vector<8x64xf32>
    %128 = tpu.matmul %126, %127, %cst_49 {dimension_numbers = #tpu.dot_dimension_numbers<[1], [0], [0], [1], [0, 0, 1, 1], [], []>} : vector<8x192xbf16>, vector<192x64xbf16>, vector<8x64xf32> -> vector<8x64xf32>
    %129 = arith.addf %99, %128 : vector<8x64xf32>
    %c0_50 = arith.constant 0 : index
    %c0_51 = arith.constant 0 : index
    %130 = vector.load %arg13[%c0_50, %c0_51] : memref<8x64xf32, #tpu.memory_space<vmem>>, vector<8x64xf32>
    tpu.vector_store %arg13[%c0_50, %c0_51], %129 {strides = array<i32>} : memref<8x64xf32, #tpu.memory_space<vmem>>, vector<8x64xf32>,
    return
  }
  func.func @transform_0(%arg0: i32) -> (i32, i32, i32) {
    %c0_i32 = arith.constant 0 : i32
    %c0_i32_0 = arith.constant 0 : i32
    %c0_i32_1 = arith.constant 0 : i32
    return %arg0, %c0_i32, %c0_i32_0 : i32, i32, i32
  }
  func.func @transform_1(%arg0: i32) -> (i32, i32) {
    %c0_i32 = arith.constant 0 : i32
    %c0_i32_0 = arith.constant 0 : i32
    %c0_i32_1 = arith.constant 0 : i32
    return %c0_i32, %c0_i32_0 : i32, i32
  }
  func.func @transform_2(%arg0: i32) -> (i32, i32) {
    %c0_i32 = arith.constant 0 : i32
    %c0_i32_0 = arith.constant 0 : i32
    %c0_i32_1 = arith.constant 0 : i32
    return %c0_i32, %c0_i32_0 : i32, i32
  }
  func.func @transform_3(%arg0: i32) -> (i32, i32) {
    %c0_i32 = arith.constant 0 : i32
    %c0_i32_0 = arith.constant 0 : i32
    %c0_i32_1 = arith.constant 0 : i32
    return %c0_i32, %c0_i32_0 : i32, i32
  }
  func.func @transform_4(%arg0: i32) -> (i32, i32) {
    %c0_i32 = arith.constant 0 : i32
    %c0_i32_0 = arith.constant 0 : i32
    %c0_i32_1 = arith.constant 0 : i32
    return %c0_i32, %c0_i32_0 : i32, i32
  }
  func.func @transform_5(%arg0: i32) -> (i32, i32) {
    %c0_i32 = arith.constant 0 : i32
    %c0_i32_0 = arith.constant 0 : i32
    %c0_i32_1 = arith.constant 0 : i32
    return %c0_i32, %c0_i32_0 : i32, i32
  }
  func.func @transform_6(%arg0: i32) -> (i32, i32) {
    %c0_i32 = arith.constant 0 : i32
    %c0_i32_0 = arith.constant 0 : i32
    %c0_i32_1 = arith.constant 0 : i32
    return %c0_i32, %c0_i32_0 : i32, i32
  }
  func.func @transform_7(%arg0: i32) -> (i32, i32) {
    %c0_i32 = arith.constant 0 : i32
    %c0_i32_0 = arith.constant 0 : i32
    %c0_i32_1 = arith.constant 0 : i32
    return %c0_i32, %c0_i32_0 : i32, i32
  }
  func.func @transform_8(%arg0: i32) -> (i32, i32) {
    %c0_i32 = arith.constant 0 : i32
    %c0_i32_0 = arith.constant 0 : i32
    %c0_i32_1 = arith.constant 0 : i32
    return %c0_i32, %c0_i32_0 : i32, i32
  }
  func.func @transform_9(%arg0: i32) -> (i32, i32) {
    %c0_i32 = arith.constant 0 : i32
    %c0_i32_0 = arith.constant 0 : i32
    %c0_i32_1 = arith.constant 0 : i32
    return %c0_i32, %c0_i32_0 : i32, i32
  }
  func.func @transform_10(%arg0: i32) -> (i32, i32, i32, i32) {
    %c0_i32 = arith.constant 0 : i32
    %c0_i32_0 = arith.constant 0 : i32
    %c0_i32_1 = arith.constant 0 : i32
    %c0_i32_2 = arith.constant 0 : i32
    return %arg0, %c0_i32, %c0_i32_0, %c0_i32_1 : i32, i32, i32, i32
  }
  func.func @transform_11(%arg0: i32) -> (i32, i32, i32, i32) {
    %c0_i32 = arith.constant 0 : i32
    %c0_i32_0 = arith.constant 0 : i32
    %c0_i32_1 = arith.constant 0 : i32
    %c0_i32_2 = arith.constant 0 : i32
    return %arg0, %c0_i32, %c0_i32_0, %c0_i32_1 : i32, i32, i32, i32
  }
  func.func @transform_12(%arg0: i32) -> (i32, i32) {
    %c0_i32 = arith.constant 0 : i32
    %c0_i32_0 = arith.constant 0 : i32
    return %arg0, %c0_i32 : i32, i32
  }
  func.func @transform_13(%arg0: i32) -> (i32, i32, i32, i32) {
    %c0_i32 = arith.constant 0 : i32
    %c0_i32_0 = arith.constant 0 : i32
    %c0_i32_1 = arith.constant 0 : i32
    %c0_i32_2 = arith.constant 0 : i32
    return %arg0, %c0_i32, %c0_i32_0, %c0_i32_1 : i32, i32, i32, i32
  }
  func.func @transform_14(%arg0: i32) -> (i32, i32, i32, i32) {
    %c0_i32 = arith.constant 0 : i32
    %c0_i32_0 = arith.constant 0 : i32
    %c0_i32_1 = arith.constant 0 : i32
    %c0_i32_2 = arith.constant 0 : i32
    return %arg0, %c0_i32, %c0_i32_0, %c0_i32_1 : i32, i32, i32, i32
  }
}

</mosaic_0001>

<bundles_post_ra>
// kernel: encoder_block_forward.1
= control target key start
LH: loop header
LB: loop body
LE: loop exit
PB: predicated region body
PF: predicated region fallthrough
CT: control target
= control target key end

     0   :  { %s2740_s0 = inlined_call_operand.vmem [shape: f32[2,8,64], index: 0, kind: input, shape index: {}]   ;;  %s2741_s1 = inlined_call_operand.vmem [shape: f32[1,64], index: 1, kind: input, shape index: {}]   ;;  %s2742_s2 = inlined_call_operand.vmem [shape: f32[1,64], index: 2, kind: input, shape index: {}]   ;;  %s2743_s3 = inlined_call_operand.vmem [shape: bf16[64,128], index: 3, kind: input, shape index: {}]   ;;  %s2744_s4 = inlined_call_operand.vmem [shape: bf16[64,64], index: 4, kind: input, shape index: {}]   ;;  %s2745_s5 = inlined_call_operand.vmem [shape: bf16[64,384], index: 5, kind: input, shape index: {}]   ;;  %s2746_s6 = inlined_call_operand.vmem [shape: bf16[192,64], index: 6, kind: input, shape index: {}]   ;;  %s2747_s7 = inlined_call_operand.vmem [shape: f32[8,96], index: 7, kind: input, shape index: {}]   ;;  %s2748_s8 = inlined_call_operand.vmem [shape: f32[8,96], index: 8, kind: input, shape index: {}]   ;;  %s2749_s9 = inlined_call_operand.vmem [shape: f32[8,96], index: 9, kind: input, shape index: {}]   ;;  %s2750_s10 = inlined_call_operand.vmem [shape: f32[2,16,2,16], index: 10, kind: input, shape index: {}, may-alias: {10,13}]   ;;  %s2751_s11 = inlined_call_operand.vmem [shape: f32[2,16,2,16], index: 11, kind: input, shape index: {}, may-alias: {11,14}]   ;;  %s2752_s12 = inlined_call_operand.hbm [shape: f32[16,64], index: 12, kind: output, shape index: {0}]   ;;  %s2753_s13 = inlined_call_operand.vmem [shape: f32[2,16,2,16], index: 13, kind: output, shape index: {1}, may-alias: {10,13}]   ;;  %s2754_s14 = inlined_call_operand.vmem [shape: f32[2,16,2,16], index: 14, kind: output, shape index: {2}, may-alias: {11,14}]  }
   0x1   :  { %2763 = sst [smem:[#allocation5_spill]] %s2740_s0 }
   0x2   :  { %2764 = sst [smem:[#allocation6_spill]] %s2741_s1 }
   0x3   :  { %2765 = sst [smem:[#allocation7_spill]] %s2742_s2 }
   0x4   :  { %2766 = sst [smem:[#allocation8_spill]] %s2743_s3 }
   0x5   :  { %2767 = sst [smem:[#allocation9_spill]] %s2744_s4 }
   0x6   :  { %20 = vsyncpa [#allocation3], 0 }
   0x7   :  { %22 = vsyncpa [#allocation3 + $0x1], 0  ;;  %s2228_s29 = smov 0   ;;  %s2230_s30 = smov 0  }
   0x8   :  { %s2232_s15 = smov 0   ;;  %s2234_s10 = smov 0  }
   0x9 LB: > { %s2249_s11 = sadd.s32 4294967295, %s2136_s10   ;;  %s1812_s16 = sadd.s32 4294967294, %s2136_s10   ;;  %s2136_s10 = sphi %s2234_s10, %s2782_s10   ;;  %s2132_s15 = sphi %s2232_s15, %s2781_s15   ;;  %s2128_s30 = sphi %s2230_s30, %s2780_s30   ;;  %s2124_s29 = sphi %s2228_s29, %s2779_s29  }
   0xa   : > { %s2253_s17 = sadd.s32 1, %s2136_s10   ;;  %s302_s18 = sadd.s32 1, %s2132_s15 }
   0xb   : > { %s299_s19 = ssub.s32 %s2136_s10, %s2253_s17  ;;  %p312_p0 = scmp.ne.s32.totalorder %s2132_s15, %s2128_s30 }
   0xc   : > { %p300_p1 = scmp.eq.s32.totalorder %s299_s19, 0  ;;  %p313_p2 = scmp.eq.s32.totalorder %s2249_s11, 1 }
   0xd   : > { %p318_p3 = scmp.ne.s32.totalorder %s2128_s30, %s2124_s29  ;;  %p319_p4 = scmp.eq.s32.totalorder %s1812_s16, 1 }
   0xe   : > { %s2264_s20 = scalar_select %p300_p1, %s2132_s15, %s302_s18  }
   0xf   : > { %p2266_p5 = por %p313_p2, %p312_p0  ;;  %p2270_p6 = por %p319_p4, %p318_p3 }
  0x10   : > { %p1815_p7 = scmp.ge.s32.totalorder %s2136_s10, 1  ;;  %p439_p8 = scmp.lt.s32.totalorder %s2136_s10, 3 }
  0x12   : > { %p440_p9 = pnand %p1815_p7, %p439_p8 }
  0x13   : > { %p504_p10 = scmp.lt.s32.totalorder (!%p440_p9), %s2249_s11, 1  ;;  %s2770_s0 = sld [smem:[#allocation5_spill]] (!%p440_p9) }
  0x14   : > { %443 = sbr.rel (%p440_p9) target bundleno = 2327 (0x917), region = 68  ;;  %s2771_s3 = sld [smem:[#allocation8_spill]] (!%p440_p9) }
  0x15   : > { %s2772_s1 = sld [smem:[#allocation6_spill]] (!%p440_p9)  ;;  %s2140_s18 = smov (!%p440_p9), 95  }
  0x16   : > { %s2141_s19 = smov (!%p440_p9), 127   ;;  %s2143_s25 = smov (!%p440_p9), 112  }
  0x17   : > { %s2144_s26 = smov (!%p440_p9), 1   ;;  %s2773_s4 = sld [smem:[#allocation9_spill]] (!%p440_p9) }
  0x18   : > { %s2755_s28 = smov (!%p440_p9), 16   ;;  %s2778_s2 = sld [smem:[#allocation7_spill]] (!%p440_p9) }
  0x19   : > { %s2278_s23 = scalar_select %p504_p10, %s2249_s11, 1  ;;  %vm531_vm0 = vcmask 523264   ;;  %v2138_v4 = vmov 0.0   ;;  %vm2139_vm1 = vmmov 0   ;;  %vm635_vm2 = vcmask 777216   ;;  %v625_v22 = vld [vmem:[%s2748_s8] sm:$0xff] }
  0x1a   : > { %v2012_v3 = vld [vmem:[%s2771_s3 + $0x18] sm:$0xff]   ;;  %1894 = vmatprep.subr.bf16.mxu0 %v2138_v4  ;;  %1902 = vmatprep.mubr.msk.bf16.mxu0 %vm2139_vm1, %v2138_v4  ;;  %v2013_v5 = vld [vmem:[%s2771_s3 + $0x10] sm:$0xff]   ;;  %v2014_v6 = vld [vmem:[%s2771_s3 + $0x8] sm:$0xff]   ;;  %vm645_vm3 = vcmask 7168   ;;  %vm960_vm4 = vcmask 130048   ;;  %vm1058_vm5 = vcmask 64512  }
  0x1b   : > { %s1817_s24 = sshll.u32 %s2278_s23, 3  ;;  %1895 = vmatpush3.bf16.msra.mxu0 %v2012_v3  ;;  %1906 = vmatprep.subr.bf16.mxu1 %v2138_v4  ;;  %v2015_v7 = vld [vmem:[%s2771_s3] sm:$0xff]   ;;  %vm1109_vm6 = vcmask 1043456   ;;  %vm1221_vm7 = vcmask 261120   ;;  %vm1223_vm8 = vcmask 392192   ;;  %vm755_vm9 = vcmask 122880  }
  0x1c   : > { %s507_s27 = scalar_lea.vmem %s2770_s0, %s1817_s24  ;;  %1896 = vmatprep.subr.bf16.mxu0 %v2138_v4  ;;  %1908 = vmatprep.mubr.msk.bf16.mxu1 %vm2139_vm1, %v2138_v4  ;;  %v1822_v12 = vld [vmem:[%s2772_s1] ss:$0 sm:$0xff]  ;;  %s2142_s24 = smov 33  }
  0x1d   : > { %v2284_v0 = vld [vmem:[%s507_s27] sm:$0xff]  ;;  %s2146_s27 = smov 96   ;;  %s2152_s1 = smov [#allocation2]  }
  0x1e   : > { %v530_v1 = vmul.f32 %v2284_v0, %v2284_v0  ;;  %v624_v25 = vld [vmem:[%s2747_s7] sm:$0xff] }
  0x1f   : > { %1897 = vmatpush3.bf16.msra.mxu0 %v2013_v5  ;;  %v626_v27 = vld [vmem:[%s2749_s9] sm:$0xff] }
  0x20   : > { %v532_v2 = vsel %vm531_vm0, %v530_v1, 0.0  ;;  %1898 = vmatprep.subr.bf16.mxu0 %v2138_v4 }
  0x21   : > { %533 = vadd.xlane.f32.xlu0 %v532_v2 }
  0x23   : > { %1899 = vmatpush3.bf16.msra.mxu0 %v2014_v6 }
  0x24   : > { %1900 = vmatprep.subr.bf16.mxu0 %v2138_v4 }
  0x27   : > { %1901 = vmatpush3.bf16.msra.mxu0 %v2015_v7 }
  0x28   : > { %1918 = vmatprep.subr.bf16.mxu0 %v2138_v4 }
  0xaa   : > { %v534_v8 = vpop.xlane.xlu0 %533 }
  0xab   : > { %v536_v9 = vmul.f32 0.015625, %v534_v8 }
  0xad   : > { %v537_v10 = vadd.f32 1e-05, %v536_v9 }
  0xaf   : > { %2048 = vrsqrt.f32 %v537_v10 }
  0xbc   : > { %v2049_v11 = vpop.eup %2048 }
  0xbd   : > { %v539_v13 = vmul.f32 %v2049_v11, %v2284_v0 }
  0xbf   : > { %v547_v14 = vmul.f32 %v1822_v12, %v539_v13 }
  0xc1   : > { %v548_v15 = vpack.c.bf16 %v547_v14, %v547_v14 }
  0xc3   : > { %1903 = vmatmul.mubr.msk.bf16.vlgmr.msra.gmra.mxu0 %vm531_vm0, %v548_v15 }
  0xc4   : > { %1920 = vmatprep.mubr.msk.bf16.mxu0 %vm2139_vm1, %v2138_v4 }
 0x183   : > { %v2318_v16 = vpop.f32.mrf.mxu0 }
 0x184   : > { %632 = vrot.lane.b32.xlu1 %v2318_v16, %s2140_s18  ;;  %629 = vrot.lane.b32.xlu0 %v2318_v16, %s2141_s19  ;;  %v627_v28 = vmul.f32 %v624_v25, %v2318_v16  ;;  %v1101_v61 = vpack.c.bf16 %v2318_v16, %v2318_v16  ;;  %s2757_s19 = smov 48   ;;  %s2776_s18 = smov 48  }
 0x185   : > { %v1904_v17 = vpop.f32.mrf.mxu0 }
 0x187   : > { %v621_v18 = vpop.f32.mrf.mxu0 }
 0x188   : > { %639 = vrot.lane.b32.xlu1 %v2318_v16, %s2142_s24  ;;  %950 = vrot.lane.b32.xlu0 %v2318_v16, %s2143_s25  ;;  %s2774_s24 = smov 64  }
 0x189   : > { %v1905_v19 = vpop.f32.mrf.mxu0 }
 0x18c   : > { %642 = vrot.lane.b32.xlu1 %v2318_v16, %s2144_s26  ;;  %s2761_s26 = smov 64  }
 0x1f6   : > { %v633_v20 = vpop.permute.xlu1 %632  ;;  %v630_v21 = vpop.permute.xlu0 %629 }
 0x1f7   : > { %v636_v23 = vsel %vm635_vm2, %v630_v21, %v633_v20 }
 0x1f8   : > { %v637_v26 = vmul.f32 %v636_v23, %v625_v22 }
 0x1fa   : > { %v640_v24 = vpop.permute.xlu1 %639  ;;  %v638_v31 = vadd.f32 %v637_v26, %v627_v28  ;;  %v951_v59 = vpop.permute.xlu0 %950  ;;  %v2016_v28 = vld [vmem:[%s2773_s4 + $0x18] sm:$0xff]  }
 0x1fb   : > { %v1102_v60 = vpack.c.bf16 %v951_v59, %v951_v59 }
 0x1fe   : > { %v643_v29 = vpop.permute.xlu1 %642 }
 0x1ff   : > { %v646_v30 = vsel %vm645_vm3, %v640_v24, %v643_v29  ;;  %v2017_v29 = vld [vmem:[%s2773_s4 + $0x10] sm:$0xff]  }
 0x200   : > { %v647_v32 = vmul.f32 %v646_v30, %v626_v27 }
 0x202   : > { %v2335_v33 = vadd.f32 %v647_v32, %v638_v31 }
 0x204   : > { %941 = vrot.lane.b32.xlu1 %v2335_v33, %s2143_s25  ;;  %v955_v34 = vpack.c.bf16 %v2335_v33, %v2335_v33  ;;  %s2759_s25 = smov 32  }
 0x208   : > { %958 = vrot.lane.b32.xlu1 %v955_v34, %s2761_s26 }
 0x276   : > { %v942_v35 = vpop.permute.xlu1 %941 }
 0x277   : > { %v956_v36 = vpack.c.bf16 %v942_v35, %v942_v35  ;;  %v2007_v38 = vpack.i.bf16 %v942_v35, %v2335_v33  ;;  %v953_v40 = vpack.c.bf16 %v942_v35, %v2335_v33 }
 0x279   : > { %1009 = vrot.lane.b32.xlu1 %v956_v36, %s2761_s26  ;;  %s2775_s26 = smov 32  }
 0x27a   : > { %v959_v37 = vpop.permute.xlu1 %958 }
 0x27b   : > { %v965_v39 = vsel %vm960_vm4, %v959_v37, 0  ;;  %v2018_v37 = vld [vmem:[%s2773_s4 + $0x8] sm:$0xff]  }
 0x27c   : > { %1907 = vmatpush3.bf16.xpose.msra.mxu1 %v965_v39 }
 0x27d   : > { %2008 = vrot.lane.b32.xlu1 %v2007_v38, %s2146_s27  ;;  %1912 = vmatprep.subr.bf16.mxu1 %v2138_v4 }
 0x283   : > { %1909 = vmatmul.mubr.msk.bf16.vlgmr.msra.gmra.mxu1 %vm960_vm4, %v953_v40  ;;  %v2019_v40 = vld [vmem:[%s2773_s4] sm:$0xff]  }
 0x284   : > { %1914 = vmatprep.mubr.msk.bf16.mxu1 %vm2139_vm1, %v2138_v4 }
 0x2eb   : > { %v1010_v41 = vpop.permute.xlu1 %1009 }
 0x2ec   : > { %v1015_v42 = vsel %vm960_vm4, %v1010_v41, 0 }
 0x2ed   : > { %1913 = vmatpush3.bf16.xpose.msra.mxu1 %v1015_v42 }
 0x2ee   : > { %1924 = vmatprep.subr.bf16.mxu1 %v2138_v4 }
 0x2ef   : > { %v2009_v43 = vpop.permute.xlu1 %2008 }
 0x2f0   : > { %v2011_v44 = vunpack.i.h.bf16 %v2009_v43  ;;  %v2010_v45 = vunpack.i.l.bf16 %v2009_v43 }
 0x2f2   : > { %v954_v46 = vpack.c.bf16 %v2011_v44, %v2010_v45 }
 0x2f4   : > { %1915 = vmatmul.mubr.msk.bf16.vlgmr.msra.gmra.mxu1 %vm960_vm4, %v954_v46 }
 0x2f5   : > { %1926 = vmatprep.mubr.msk.bf16.mxu1 %vm2139_vm1, %v2138_v4 }
 0x343   : > { %v1001_v47 = vpop.f32.mrf.mxu1 }
 0x344   : > { %v1059_v48 = vsel %vm1058_vm5, %v1001_v47, -inf }
 0x345   : > { %1060 = vmax.xlane.f32.xlu1 %v1059_v48  ;;  %v1910_v49 = vpop.f32.mrf.mxu1 }
 0x347   : > { %v1004_v50 = vpop.f32.mrf.mxu1 }
 0x348   : > { %v1062_v51 = vsel %vm1058_vm5, %v1004_v50, -inf }
 0x349   : > { %1063 = vmax.xlane.f32.xlu0 %v1062_v51  ;;  %v1911_v52 = vpop.f32.mrf.mxu1 }
 0x3b4   : > { %v1051_v53 = vpop.f32.mrf.mxu1 }
 0x3b5   : > { %v1065_v54 = vsel %vm1058_vm5, %v1051_v53, -inf }
 0x3b6   : > { %1066 = vmax.xlane.f32.xlu0 %v1065_v54  ;;  %v1916_v55 = vpop.f32.mrf.mxu1 }
 0x3b8   : > { %v1054_v56 = vpop.f32.mrf.mxu1 }
 0x3b9   : > { %v1068_v57 = vsel %vm1058_vm5, %v1054_v56, -inf }
 0x3ba   : > { %1069 = vmax.xlane.f32.xlu1 %v1068_v57  ;;  %v1917_v58 = vpop.f32.mrf.mxu1 }
 0x3cb   : > { %1155 = vrot.lane.b32.xlu1 %v1102_v60, %s2759_s25 }
 0x3cc   : > { %1104 = vrot.lane.b32.xlu0 %v1101_v61, %s2759_s25 }
 0x3ce   : > { %v1061_v62 = vpop.xlane.xlu1 %1060 }
 0x3cf   : > { %v1071_v63 = vsub.f32 %v1001_v47, %v1061_v62 }
 0x3d1   : > { %v1075_v1 = vmul.f32 1.442695, %v1071_v63 }
 0x3d2   : > { %v1064_v2 = vpop.xlane.xlu0 %1063 }
 0x3d3   : > { %v1072_v3 = vsub.f32 %v1004_v50, %v1064_v2  ;;  %2050 = vpow2.f32 %v1075_v1  ;;  %v2150_v1 = vmov 1966171168  }
 0x3d4   : > { %v652_v2 = vunpack.c.l.s4 %v2150_v1 }
 0x3d5   : > { %v1077_v5 = vmul.f32 1.442695, %v1072_v3  ;;  %v654_v3 = vlaneseq }
 0x3d7   : > { %2052 = vpow2.f32 %v1077_v5 }
 0x3e0   : > { %v2051_v6 = vpop.eup %2050 }
 0x3e1   : > { %v1083_v10 = vsel %vm1058_vm5, %v2051_v6, 0.0 }
 0x3e4   : > { %v2053_v7 = vpop.eup %2052 }
 0x3e5   : > { %v1099_v8 = vpack.c.bf16 %v2053_v7, %v2051_v6  ;;  %v1086_v9 = vsel %vm1058_vm5, %v2053_v7, 0.0  ;;  %v653_v7 = vunpack.c.0.s8 %v652_v2  ;;  %v2036_v2 = vld [vmem:[%s2746_s6 + $0x38] sm:$0xff]  }
 0x3ef   : > { %1087 = vadd.xlane.f32.xlu1 %v1086_v9  ;;  %v650_v9 = vcombine.high %v2335_v33, %v2335_v33 }
 0x3f3   : > { %1084 = vadd.xlane.f32.xlu1 %v1083_v10 }
 0x43f   : > { %v1067_v11 = vpop.xlane.xlu0 %1066 }
 0x440   : > { %v1073_v12 = vsub.f32 %v1051_v53, %v1067_v11 }
 0x442   : > { %v1079_v13 = vmul.f32 1.442695, %v1073_v12  ;;  %v764_v12 = vcombine.high %v2318_v16, %v2318_v16 }
 0x443   : > { %v1105_v14 = vpop.permute.xlu0 %1104  ;;  %v1070_v15 = vpop.xlane.xlu1 %1069 }
 0x444   : > { %2054 = vpow2.f32 %v1079_v13  ;;  %v1111_v17 = vsel %vm1109_vm6, %v1105_v14, 0  ;;  %v1074_v18 = vsub.f32 %v1054_v56, %v1070_v15  ;;  %v2020_v13 = vld [vmem:[%s2745_s5 + $0x48] ss:$12 sps:$4 sm:$0xff]   ;;  %v2022_v14 = vld [vmem:[%s2745_s5 + $0x4c] ss:$12 sps:$4 sm:$0xff]  }
 0x445   : > { %1919 = vmatpush3.bf16.msra.mxu0 %v1111_v17 }
 0x446   : > { %v1081_v19 = vmul.f32 1.442695, %v1074_v18  ;;  %1930 = vmatprep.subr.bf16.mxu0 %v2138_v4 }
 0x447   : > { %v1156_v20 = vpop.permute.xlu1 %1155 }
 0x448   : > { %2056 = vpow2.f32 %v1081_v19  ;;  %v1161_v21 = vsel %vm1109_vm6, %v1156_v20, 0  ;;  %1921 = vmatmul.mubr.msk.bf16.vlgmr.msra.gmra.mxu0 %vm1058_vm5, %v1099_v8  ;;  %v655_v8 = vshrl.u32 %v654_v3, 7  ;;  %v2023_v19 = vld [vmem:[%s2745_s5 + $0x30] ss:$12 sps:$4 sm:$0xff]   ;;  %v2025_v20 = vld [vmem:[%s2745_s5 + $0x34] ss:$12 sps:$4 sm:$0xff]  }
 0x449   : > { %1925 = vmatpush3.bf16.msra.mxu1 %v1161_v21  ;;  %1938 = vmatprep.mubr.msk.bf16.mxu0 %vm2139_vm1, %v2138_v4  ;;  %v2038_v3 = vld [vmem:[%s2746_s6 + $0x28] sm:$0xff]  }
 0x44a   : > { %1931 = vmatpush3.bf16.msra.mxu0 %v2016_v28  ;;  %v2399_v10 = vsub.s32 %v653_v7, %v655_v8  ;;  %v2417_v18 = vsub.s32 0, %v655_v8  ;;  %v2029_v28 = vld [vmem:[%s2745_s5] ss:$12 sps:$4 sm:$0xff]   ;;  %v2041_v7 = vld [vmem:[%s2746_s6 + $0x10] sm:$0xff]  }
 0x44b   : > { %1932 = vmatprep.subr.bf16.mxu0 %v2138_v4  ;;  %v2042_v8 = vld [vmem:[%s2746_s6 + $0x8] sm:$0xff]  }
 0x44c   : > { %v2415_v17 = vrot.slane %v764_v12, %v2399_v10  ;;  %v2045_v12 = vld [vmem:[%s2746_s6 + $0x50] sm:$0xff]  }
 0x44e   : > { %1933 = vmatpush3.bf16.msra.mxu0 %v2017_v29  ;;  %v2031_v29 = vld [vmem:[%s2745_s5 + $0x4] ss:$12 sps:$4 sm:$0xff]  }
 0x44f   : > { %1934 = vmatprep.subr.bf16.mxu0 %v2138_v4 }
 0x451   : > { %v2055_v22 = vpop.eup %2054 }
 0x452   : > { %v1089_v23 = vsel %vm1058_vm5, %v2055_v22, 0.0  ;;  %1935 = vmatpush3.bf16.msra.mxu0 %v2018_v37  ;;  %v2469_v37 = vrot.slane %v2318_v16, %v2399_v10 }
 0x453   : > { %1090 = vadd.xlane.f32.xlu0 %v1089_v23  ;;  %1936 = vmatprep.subr.bf16.mxu0 %v2138_v4  ;;  %v2026_v23 = vld [vmem:[%s2745_s5 + $0x18] ss:$12 sps:$4 sm:$0xff]  }
 0x455   : > { %v2057_v24 = vpop.eup %2056 }
 0x456   : > { %v1092_v25 = vsel %vm1058_vm5, %v2057_v24, 0.0  ;;  %v1100_v26 = vpack.c.bf16 %v2057_v24, %v2055_v22  ;;  %1937 = vmatpush3.bf16.msra.mxu0 %v2019_v40  ;;  %v794_v22 = vrot.slane %v2415_v17, %v2399_v10  ;;  %v2028_v24 = vld [vmem:[%s2745_s5 + $0x1c] ss:$12 sps:$4 sm:$0xff]  }
 0x457   : > { %1093 = vadd.xlane.f32.xlu0 %v1092_v25  ;;  %1410 = vmatprep.subr.bf16.mxu0 %v2022_v14 }
 0x458   : > { %1927 = vmatmul.mubr.msk.bf16.vlgmr.msra.gmra.mxu1 %vm1058_vm5, %v1100_v26  ;;  %v832_v25 = vrot.slane %v794_v22, %v2417_v18  ;;  %v810_v26 = vcombine.high %v794_v22, %v794_v22 }
 0x478   : > { %v1088_v27 = vpop.xlane.xlu1 %1087 }
 0x479   : > { %2058 = vrcp.f32 %v1088_v27  ;;  %v2438_v27 = vrot.slane %v2335_v33, %v2399_v10  ;;  %v2151_v33 = vmov 0  }
 0x47a   : > { %1607 = vmatprep.subr.bf16.mxu1 %v2151_v33 }
 0x47b   : > { %1608 = vmatpush1.bf16.msra.mxu1 %v2036_v2  ;;  %v665_v22 = vcombine.high %v2438_v27, %v2438_v27 }
 0x47c   : > { %v1085_v49 = vpop.xlane.xlu1 %1084  ;;  %1609 = vmatprep.subr.bf16.mxu1 %v2151_v33 }
 0x486   : > { %v2059_v34 = vpop.eup %2058 }
 0x4dc   : > { %v1091_v30 = vpop.xlane.xlu0 %1090 }
 0x4dd   : > { %2060 = vrcp.f32 %v1091_v30  ;;  %v840_v30 = vrot.slane %v810_v26, %v2417_v18 }
 0x4e0   : > { %v1094_v35 = vpop.xlane.xlu0 %1093 }
 0x4e1   : > { %2062 = vrcp.f32 %v1094_v35 }
 0x4e2   : > { %2064 = vrcp.f32 %v1085_v49  ;;  %v1837_v49 = vld [vmem:[%s2778_s2] ss:$0 sm:$0xff]  ;;  %s2080_s2 = sshll.u32 %s2152_s1, 4  ;;  %s2081_s2 = int_to_ptr.vmem [resolvable:$false] %s2080_s2 }
 0x4ea   : > { %v2061_v41 = vpop.eup %2060 }
 0x4ee   : > { %v2063_v45 = vpop.eup %2062 }
 0x4ef   : > { %v2065_v50 = vpop.eup %2064 }
 0x508   : > { %v1147_v31 = vpop.f32.mrf.mxu0 }
 0x509   : > { %v1204_v53 = vmul.f32 %v2065_v50, %v1147_v31  ;;  %v673_v31 = vrot.slane %v2438_v27, %v2399_v10 }
 0x50a   : > { %v1922_v32 = vpop.f32.mrf.mxu0 }
 0x50b   : > { %v2455_v32 = vrot.slane %v673_v31, %v2417_v18 }
 0x50c   : > { %v1150_v36 = vpop.f32.mrf.mxu0 }
 0x50d   : > { %v1205_v38 = vmul.f32 %v2059_v34, %v1150_v36  ;;  %v695_v34 = vcombine.high %v673_v31, %v673_v31 }
 0x50e   : > { %v1923_v39 = vpop.f32.mrf.mxu0 }
 0x50f   : > { %1209 = vrot.lane.b32.xlu0 %v1205_v38, %s2755_s28  ;;  %v2460_v35 = vrot.slane %v695_v34, %v2417_v18  ;;  %v787_v38 = vrot.slane %v2469_v37, %v2399_v10  ;;  %s2777_s28 = smov 16  }
 0x511   : > { %v2477_v39 = vrot.slane %v787_v38, %v2417_v18  ;;  %v809_v40 = vcombine.high %v787_v38, %v787_v38 }
 0x518   : > { %v1197_v42 = vpop.f32.mrf.mxu1 }
 0x519   : > { %v1206_v43 = vmul.f32 %v2061_v41, %v1197_v42  ;;  %v2482_v41 = vrot.slane %v809_v40, %v2417_v18 }
 0x51a   : > { %v1928_v44 = vpop.f32.mrf.mxu1 }
 0x51b   : > { %1213 = vrot.lane.b32.xlu1 %v1206_v43, %s2759_s25  ;;  %s1869_s25 = sshll.u32 %s2278_s23, 5 }
 0x51c   : > { %v1200_v46 = vpop.f32.mrf.mxu1  ;;  %s2492_s16 = scalar_lea.vmem %s2753_s13, %s1869_s25  ;;  %s2499_s23 = scalar_lea.vmem %s2754_s14, %s1869_s25 }
 0x51d   : > { %v1207_v47 = vmul.f32 %v2063_v45, %v1200_v46  ;;  %s2082_s25 = scalar_lea.vmem %s2081_s2, 256 }
 0x51e   : > { %v1929_v48 = vpop.f32.mrf.mxu1 }
 0x51f   : > { %1217 = vrot.lane.b32.xlu1 %v1207_v47, %s2757_s19 }
 0x581   : > { %v1210_v51 = vpop.permute.xlu0 %1209 }
 0x582   : > { %v1220_v54 = vsel %vm960_vm4, %v1204_v53, %v1210_v51  ;;  %v2032_v53 = vld [vmem:[%s2745_s5 + $0x50] ss:$12 sps:$4 sm:$0xff]  }
 0x58d   : > { %v1214_v52 = vpop.permute.xlu1 %1213 }
 0x58e   : > { %v1222_v55 = vsel %vm1221_vm7, %v1220_v54, %v1214_v52 }
 0x591   : > { %v1218_v56 = vpop.permute.xlu1 %1217 }
 0x592   : > { %v1224_v57 = vsel %vm1223_vm8, %v1222_v55, %v1218_v56  ;;  %v2033_v56 = vld [vmem:[%s2745_s5 + $0x38] ss:$12 sps:$4 sm:$0xff]  }
 0x593   : > { %v1225_v58 = vpack.c.bf16 %v1224_v57, %v1224_v57 }
 0x595   : > { %1939 = vmatmul.mubr.msk.bf16.vlgmr.msra.gmra.mxu0 %vm531_vm0, %v1225_v58  ;;  %v2034_v58 = vld [vmem:[%s2745_s5 + $0x20] ss:$12 sps:$4 sm:$0xff]  }
 0x596   : > { %1411 = vmatpush1.bf16.msra.mxu0 %v2020_v13  ;;  %1434 = vmatprep.mubr.bf16.mxu0 %v2151_v33  ;;  %v2046_v13 = vld [vmem:[%s2746_s6 + $0x48] sm:$0xff]  }
 0x597   : > { %1412 = vmatprep.subr.bf16.mxu0 %v2025_v20  ;;  %v2047_v20 = vld [vmem:[%s2746_s6 + $0x40] sm:$0xff]  }
 0x59a   : > { %1413 = vmatpush1.bf16.msra.mxu0 %v2023_v19 }
 0x59b   : > { %1414 = vmatprep.subr.bf16.mxu0 %v2028_v24 }
 0x59e   : > { %1415 = vmatpush1.bf16.msra.mxu0 %v2026_v23 }
 0x59f   : > { %1416 = vmatprep.subr.bf16.mxu0 %v2031_v29 }
 0x5a2   : > { %1417 = vmatpush1.bf16.msra.mxu0 %v2029_v28 }
 0x5a3   : > { %1942 = vmatprep.subr.bf16.mxu0 %v2138_v4 }
 0x655   : > { %v1295_v59 = vpop.f32.mrf.mxu0 }
 0x656   : > { %v2392_v60 = vadd.f32 %v1295_v59, %v2284_v0  ;;  %v2402_v0 = vrot.slane %v650_v9, %v2399_v10  ;;  %v2043_v9 = vld [vmem:[%s2746_s6] sm:$0xff]  }
 0x657   : > { %v1940_v61 = vpop.f32.mrf.mxu0 }
 0x658   : > { %v1302_v62 = vmul.f32 %v2392_v60, %v2392_v60  ;;  %v680_v11 = vrot.slane %v2402_v0, %v2399_v10  ;;  %v2035_v61 = vld [vmem:[%s2745_s5 + $0x8] ss:$12 sps:$4 sm:$0xff]   ;;  %v666_v31 = vcombine.high %v2402_v0, %v2402_v0 }
 0x659   : > { %v1298_v63 = vpop.f32.mrf.mxu0 }
 0x65a   : > { %v1303_v5 = vsel %vm531_vm0, %v1302_v62, 0.0  ;;  %v696_v15 = vcombine.high %v680_v11, %v680_v11  ;;  %v2465_v36 = vrot.slane %v680_v11, %v2417_v18  ;;  %v2044_v11 = vld [vmem:[%s2746_s6 + $0x58] sm:$0xff]  }
 0x65b   : > { %1304 = vadd.xlane.f32.xlu0 %v1303_v5  ;;  %v1941_v6 = vpop.f32.mrf.mxu0  ;;  %v2039_v5 = vld [vmem:[%s2746_s6 + $0x20] sm:$0xff]  }
 0x65c   : > { %v726_v21 = vrot.slane %v696_v15, %v2417_v18  ;;  %v2040_v6 = vld [vmem:[%s2746_s6 + $0x18] sm:$0xff]  }
 0x671   : > { %743 = vrot.lane.b32.xlu0 %v726_v21, %s2774_s24 }
 0x675   : > { %853 = vrot.lane.b32.xlu0 %v832_v25, %s2775_s26 }
 0x679   : > { %857 = vrot.lane.b32.xlu0 %v840_v30, %s2775_s26 }
 0x67d   : > { %877 = vrot.lane.b32.xlu0 %v2455_v32, %s2776_s18 }
 0x681   : > { %881 = vrot.lane.b32.xlu0 %v2460_v35, %s2776_s18 }
 0x685   : > { %885 = vrot.lane.b32.xlu0 %v2465_v36, %s2776_s18 }
 0x689   : > { %889 = vrot.lane.b32.xlu0 %v726_v21, %s2776_s18 }
 0x68d   : > { %909 = vrot.lane.b32.xlu0 %v2477_v39, %s2777_s28 }
 0x691   : > { %913 = vrot.lane.b32.xlu0 %v2482_v41, %s2777_s28 }
 0x695   : > { %917 = vrot.lane.b32.xlu0 %v832_v25, %s2777_s28  ;;  %v687_v25 = vrot.slane %v665_v22, %v2399_v10 }
 0x697   : > { %v706_v29 = vrot.slane %v687_v25, %v2417_v18 }
 0x699   : > { %921 = vrot.lane.b32.xlu0 %v840_v30, %s2777_s28  ;;  %v697_v30 = vcombine.high %v687_v25, %v687_v25 }
 0x69b   : > { %v714_v27 = vrot.slane %v697_v30, %v2417_v18 }
 0x6e4   : > { %v1305_v16 = vpop.xlane.xlu0 %1304 }
 0x6e5   : > { %v1306_v42 = vmul.f32 0.015625, %v1305_v16  ;;  %v780_v16 = vcombine.high %v2415_v17, %v2415_v17 }
 0x6e7   : > { %v1307_v43 = vadd.f32 1e-05, %v1306_v42  ;;  %v808_v42 = vrot.slane %v780_v16, %v2399_v10 }
 0x6e8   : > { %v744_v44 = vpop.permute.xlu0 %743 }
 0x6e9   : > { %2066 = vrsqrt.f32 %v1307_v43  ;;  %762 = vst.msk [vmem:[%s2492_s16 + $0xc] sm:$0x1] %vm755_vm9, %v744_v44  ;;  %v836_v43 = vrot.slane %v808_v42, %v2417_v18 }
 0x6ec   : > { %v854_v45 = vpop.permute.xlu0 %853 }
 0x6ed   : > { %873 = vst.msk [vmem:[%s2499_s23 + $0x8] sm:$0x1] %vm755_vm9, %v854_v45 }
 0x6f0   : > { %v858_v46 = vpop.permute.xlu0 %857 }
 0x6f1   : > { %875 = vst.msk [vmem:[%s2499_s23 + $0xc] sm:$0x1] %vm755_vm9, %v858_v46 }
 0x6f4   : > { %v878_v47 = vpop.permute.xlu0 %877 }
 0x6f5   : > { %901 = vst.msk [vmem:[%s2492_s16 + $0x1] sm:$0x1] %vm755_vm9, %v878_v47 }
 0x6f6   : > { %v2067_v48 = vpop.eup %2066 }
 0x6f7   : > { %v1309_v50 = vmul.f32 %v2067_v48, %v2392_v60 }
 0x6f8   : > { %v882_v51 = vpop.permute.xlu0 %881 }
 0x6f9   : > { %903 = vst.msk [vmem:[%s2492_s16 + $0x5] sm:$0x1] %vm755_vm9, %v882_v51  ;;  %v1317_v52 = vmul.f32 %v1837_v49, %v1309_v50 }
 0x6fb   : > { %v1318_v54 = vpack.c.bf16 %v1317_v52, %v1317_v52 }
 0x6fc   : > { %v886_v55 = vpop.permute.xlu0 %885 }
 0x6fd   : > { %905 = vst.msk [vmem:[%s2492_s16 + $0x9] sm:$0x1] %vm755_vm9, %v886_v55  ;;  %1850 = vmatmul.mubr.msk.bf16.vlgmr.msra.gmra.mxu0 %vm531_vm0, %v1318_v54 }
 0x6fe   : > { %1943 = vmatpush3.bf16.msra.mxu0 %v2032_v53  ;;  %1950 = vmatprep.mubr.msk.bf16.mxu0 %vm2139_vm1, %v2138_v4 }
 0x6ff   : > { %1944 = vmatprep.subr.bf16.mxu0 %v2138_v4 }
 0x700   : > { %v890_v57 = vpop.permute.xlu0 %889 }
 0x701   : > { %907 = vst.msk [vmem:[%s2492_s16 + $0xd] sm:$0x1] %vm755_vm9, %v890_v57 }
 0x702   : > { %1945 = vmatpush3.bf16.msra.mxu0 %v2033_v56 }
 0x703   : > { %1946 = vmatprep.subr.bf16.mxu0 %v2138_v4 }
 0x704   : > { %v910_v59 = vpop.permute.xlu0 %909 }
 0x705   : > { %933 = vst.msk [vmem:[%s2499_s23 + $0x1] sm:$0x1] %vm755_vm9, %v910_v59 }
 0x706   : > { %1947 = vmatpush3.bf16.msra.mxu0 %v2034_v58 }
 0x707   : > { %1948 = vmatprep.subr.bf16.mxu0 %v2138_v4  ;;  %v2037_v4 = vld [vmem:[%s2746_s6 + $0x30] sm:$0xff]  }
 0x708   : > { %v914_v62 = vpop.permute.xlu0 %913  ;;  %1610 = vmatpush1.bf16.msra.mxu1 %v2037_v4 }
 0x709   : > { %935 = vst.msk [vmem:[%s2499_s23 + $0x5] sm:$0x1] %vm755_vm9, %v914_v62  ;;  %1611 = vmatprep.subr.bf16.mxu1 %v2151_v33 }
 0x70a   : > { %1949 = vmatpush3.bf16.msra.mxu0 %v2035_v61 }
 0x70c   : > { %v918_v63 = vpop.permute.xlu0 %917  ;;  %1612 = vmatpush1.bf16.msra.mxu1 %v2038_v3 }
 0x70d   : > { %1951 = vmatmul.mubr.msk.bf16.vlgmr.msra.gmra.mxu0 %vm531_vm0, %v1318_v54  ;;  %937 = vst.msk [vmem:[%s2499_s23 + $0x9] sm:$0x1] %vm755_vm9, %v918_v63  ;;  %1613 = vmatprep.subr.bf16.mxu1 %v2151_v33 }
 0x710   : > { %v922_v1 = vpop.permute.xlu0 %921  ;;  %1614 = vmatpush1.bf16.msra.mxu1 %v2039_v5 }
 0x711   : > { %939 = vst.msk [vmem:[%s2499_s23 + $0xd] sm:$0x1] %vm755_vm9, %v922_v1  ;;  %1615 = vmatprep.subr.bf16.mxu1 %v2151_v33 }
 0x714   : > { %1616 = vmatpush1.bf16.msra.mxu1 %v2040_v6 }
 0x715   : > { %1617 = vmatprep.subr.bf16.mxu1 %v2151_v33 }
 0x718   : > { %1618 = vmatpush1.bf16.msra.mxu1 %v2041_v7 }
 0x719   : > { %1619 = vmatprep.subr.bf16.mxu1 %v2151_v33 }
 0x71c   : > { %1620 = vmatpush1.bf16.msra.mxu1 %v2042_v8 }
 0x71d   : > { %1621 = vmatprep.subr.bf16.mxu1 %v2151_v33 }
 0x720   : > { %1622 = vmatpush1.bf16.msra.mxu1 %v2043_v9 }
 0x721   : > { %1631 = vmatprep.subr.bf16.mxu1 %v2151_v33 }
 0x724   : > { %1632 = vmatpush2.bf16.msra.mxu1 %v2044_v11 }
 0x725   : > { %1633 = vmatprep.subr.bf16.mxu1 %v2151_v33 }
 0x728   : > { %1634 = vmatpush2.bf16.msra.mxu1 %v2045_v12 }
 0x729   : > { %1635 = vmatprep.subr.bf16.mxu1 %v2151_v33 }
 0x72c   : > { %1636 = vmatpush2.bf16.msra.mxu1 %v2046_v13 }
 0x72d   : > { %1637 = vmatprep.subr.bf16.mxu1 %v2151_v33  ;;  %v694_v33 = vrot.slane %v666_v31, %v2399_v10 }
 0x72f   : > { %v698_v34 = vcombine.high %v694_v33, %v694_v33 }
 0x730   : > { %1638 = vmatpush2.bf16.msra.mxu1 %v2047_v20 }
 0x731   : > { %v730_v38 = vrot.slane %v698_v34, %v2417_v18 }
 0x7bd   : > { %v2587_v14 = vpop.f32.mrf.mxu0 }
 0x7be   : > { %v1483_v17 = vsub.f32 0.0, %v2587_v14 }
 0x7bf   : > { %v2589_v15 = vpop.f32.mrf.mxu0 }
 0x7c0   : > { %1497 = vrot.lane.b32.xlu1 %v2589_v15, %s2774_s24  ;;  %v1485_v45 = vmul.f32 1.442695, %v1483_v17 }
 0x7c1   : > { %v1440_v19 = vpop.f32.mrf.mxu0 }
 0x7c3   : > { %v1441_v21 = vpop.f32.mrf.mxu0 }
 0x7cd   : > { %v1477_v23 = vpop.f32.mrf.mxu0 }
 0x7ce   : > { %1499 = vrot.lane.b32.xlu1 %v1477_v23, %s2774_s24 }
 0x7cf   : > { %v1952_v24 = vpop.f32.mrf.mxu0 }
 0x7d1   : > { %v1480_v26 = vpop.f32.mrf.mxu0 }
 0x7d2   : > { %731 = vrot.lane.b32.xlu1 %v2455_v32, %s2774_s24  ;;  %v722_v32 = vrot.slane %v694_v33, %v2417_v18 }
 0x7d3   : > { %v1953_v28 = vpop.f32.mrf.mxu0 }
 0x7d6   : > { %733 = vrot.lane.b32.xlu1 %v706_v29, %s2774_s24 }
 0x7da   : > { %735 = vrot.lane.b32.xlu1 %v2460_v35, %s2774_s24  ;;  %v779_v35 = vcombine.high %v2469_v37, %v2469_v37 }
 0x7dc   : > { %v801_v0 = vrot.slane %v779_v35, %v2399_v10  ;;  %v1484_v10 = vsub.f32 0.0, %v2589_v15 }
 0x7de   : > { %737 = vrot.lane.b32.xlu1 %v714_v27, %s2774_s24  ;;  %v820_v40 = vrot.slane %v801_v0, %v2417_v18 }
 0x7e2   : > { %739 = vrot.lane.b32.xlu1 %v2465_v36, %s2774_s24  ;;  %v811_v36 = vcombine.high %v801_v0, %v801_v0 }
 0x7e4   : > { %v828_v37 = vrot.slane %v811_v36, %v2417_v18 }
 0x7e6   : > { %741 = vrot.lane.b32.xlu1 %v722_v32, %s2774_s24 }
 0x7ea   : > { %745 = vrot.lane.b32.xlu1 %v730_v38, %s2774_s24  ;;  %s487_s24 = sand.u32 1, %s2128_s30  }
 0x7ee   : > { %845 = vrot.lane.b32.xlu1 %v2477_v39, %s2775_s26  ;;  %v812_v39 = vcombine.high %v808_v42, %v808_v42 }
 0x7f0   : > { %v844_v44 = vrot.slane %v812_v39, %v2417_v18 }
 0x7f2   : > { %847 = vrot.lane.b32.xlu1 %v820_v40, %s2775_s26 }
 0x7f6   : > { %849 = vrot.lane.b32.xlu1 %v2482_v41, %s2775_s26  ;;  %v1487_v41 = vmul.f32 1.442695, %v1484_v10 }
 0x7f8   : > { %2068 = vpow2.f32 %v1487_v41 }
 0x7f9   : > { %2070 = vpow2.f32 %v1485_v45 }
 0x7fa   : > { %851 = vrot.lane.b32.xlu1 %v828_v37, %s2775_s26 }
 0x7fe   : > { %855 = vrot.lane.b32.xlu1 %v836_v43, %s2775_s26 }
 0x802   : > { %859 = vrot.lane.b32.xlu1 %v844_v44, %s2775_s26  ;;  %s1816_s26 = sshll.u32 %s487_s24, 3 }
 0x805   : > { %v2069_v18 = vpop.eup %2068 }
 0x806   : > { %879 = vrot.lane.b32.xlu1 %v706_v29, %s2776_s18  ;;  %v2071_v46 = vpop.eup %2070  ;;  %v1490_v47 = vadd.f32 1.0, %v2069_v18 }
 0x807   : > { %v1489_v48 = vadd.f32 1.0, %v2071_v46 }
 0x808   : > { %2072 = vrcp.f32 %v1490_v47 }
 0x809   : > { %2074 = vrcp.f32 %v1489_v48 }
 0x80a   : > { %883 = vrot.lane.b32.xlu1 %v714_v27, %s2776_s18 }
 0x80e   : > { %887 = vrot.lane.b32.xlu1 %v722_v32, %s2776_s18 }
 0x812   : > { %891 = vrot.lane.b32.xlu1 %v730_v38, %s2776_s18  ;;  %s1866_s18 = sshll.u32 %s2249_s11, 7  ;;  %s1650_s11 = scalar_lea.sflag [#allocation3], %s487_s24 }
 0x813   : > { %s2698_s0 = scalar_lea.hbm %s2752_s12, %s1866_s18 }
 0x815   : > { %v2073_v49 = vpop.eup %2072 }
 0x816   : > { %911 = vrot.lane.b32.xlu1 %v820_v40, %s2777_s28  ;;  %v2075_v51 = vpop.eup %2074  ;;  %v1494_v52 = vmul.f32 %v2073_v49, %v2589_v15 }
 0x817   : > { %v1493_v53 = vmul.f32 %v2075_v51, %v2587_v14 }
 0x81a   : > { %915 = vrot.lane.b32.xlu1 %v828_v37, %s2777_s28 }
 0x81e   : > { %919 = vrot.lane.b32.xlu1 %v836_v43, %s2777_s28 }
 0x822   : > { %923 = vrot.lane.b32.xlu1 %v844_v44, %s2777_s28  ;;  %s489_s28 = scalar_lea.vmem [#allocation2], %s1816_s26 }
 0x823   : > { %s1673_s19 = sshll.u32 %s489_s28, 4  ;;  %s2700_s19 = int_to_ptr.vmem [resolvable:$true] %s1673_s19 }
 0x824   : > { %p2083_p0 = scmp.lt.s32.totalorder %s2700_s19, %s2081_s2 }
 0x832   : > { %v1498_v50 = vpop.permute.xlu1 %1497 }
 0x840   : > { %v1500_v54 = vpop.permute.xlu1 %1499 }
 0x841   : > { %v1501_v55 = vsel %vm531_vm0, %v1498_v50, %v1500_v54  ;;  %v1505_v56 = vmul.f32 %v1500_v54, %v1494_v52 }
 0x842   : > { %v1504_v57 = vmul.f32 %v1501_v55, %v1493_v53 }
 0x843   : > { %v1507_v58 = vpack.c.bf16 %v1505_v56, %v1505_v56 }
 0x844   : > { %v1506_v59 = vpack.c.bf16 %v1504_v57, %v1504_v57  ;;  %v732_v61 = vpop.permute.xlu1 %731 }
 0x845   : > { %756 = vst.msk [vmem:[%s2492_s16] sm:$0x1] %vm755_vm9, %v732_v61  ;;  %1864 = vmatprep.mubr.msk.bf16.mxu1 %vm531_vm0, %v1507_v58 }
 0x846   : > { %1640 = vmatmul.mubr.bf16.vlgmr.msra.gmra.mxu1 %v1506_v59 }
 0x848   : > { %v734_v62 = vpop.permute.xlu1 %733 }
 0x849   : > { %757 = vst.msk [vmem:[%s2492_s16 + $0x2] sm:$0x1] %vm755_vm9, %v734_v62 }
 0x84c   : > { %v736_v63 = vpop.permute.xlu1 %735 }
 0x84d   : > { %758 = vst.msk [vmem:[%s2492_s16 + $0x4] sm:$0x1] %vm755_vm9, %v736_v63 }
 0x850   : > { %v738_v1 = vpop.permute.xlu1 %737 }
 0x851   : > { %759 = vst.msk [vmem:[%s2492_s16 + $0x6] sm:$0x1] %vm755_vm9, %v738_v1 }
 0x854   : > { %v740_v2 = vpop.permute.xlu1 %739 }
 0x855   : > { %760 = vst.msk [vmem:[%s2492_s16 + $0x8] sm:$0x1] %vm755_vm9, %v740_v2 }
 0x858   : > { %v742_v4 = vpop.permute.xlu1 %741 }
 0x859   : > { %761 = vst.msk [vmem:[%s2492_s16 + $0xa] sm:$0x1] %vm755_vm9, %v742_v4 }
 0x85c   : > { %v746_v3 = vpop.permute.xlu1 %745 }
 0x85d   : > { %763 = vst.msk [vmem:[%s2492_s16 + $0xe] sm:$0x1] %vm755_vm9, %v746_v3 }
 0x860   : > { %v846_v5 = vpop.permute.xlu1 %845 }
 0x861   : > { %869 = vst.msk [vmem:[%s2499_s23] sm:$0x1] %vm755_vm9, %v846_v5 }
 0x864   : > { %v848_v6 = vpop.permute.xlu1 %847 }
 0x865   : > { %870 = vst.msk [vmem:[%s2499_s23 + $0x2] sm:$0x1] %vm755_vm9, %v848_v6 }
 0x868   : > { %v850_v7 = vpop.permute.xlu1 %849 }
 0x869   : > { %871 = vst.msk [vmem:[%s2499_s23 + $0x4] sm:$0x1] %vm755_vm9, %v850_v7 }
 0x86c   : > { %v852_v8 = vpop.permute.xlu1 %851 }
 0x86d   : > { %872 = vst.msk [vmem:[%s2499_s23 + $0x6] sm:$0x1] %vm755_vm9, %v852_v8 }
 0x870   : > { %v856_v9 = vpop.permute.xlu1 %855 }
 0x871   : > { %874 = vst.msk [vmem:[%s2499_s23 + $0xa] sm:$0x1] %vm755_vm9, %v856_v9 }
 0x874   : > { %v860_v11 = vpop.permute.xlu1 %859 }
 0x875   : > { %876 = vst.msk [vmem:[%s2499_s23 + $0xe] sm:$0x1] %vm755_vm9, %v860_v11 }
 0x878   : > { %v880_v12 = vpop.permute.xlu1 %879 }
 0x879   : > { %902 = vst.msk [vmem:[%s2492_s16 + $0x3] sm:$0x1] %vm755_vm9, %v880_v12 }
 0x87c   : > { %v884_v13 = vpop.permute.xlu1 %883 }
 0x87d   : > { %904 = vst.msk [vmem:[%s2492_s16 + $0x7] sm:$0x1] %vm755_vm9, %v884_v13 }
 0x880   : > { %v888_v14 = vpop.permute.xlu1 %887 }
 0x881   : > { %906 = vst.msk [vmem:[%s2492_s16 + $0xb] sm:$0x1] %vm755_vm9, %v888_v14 }
 0x884   : > { %v892_v15 = vpop.permute.xlu1 %891 }
 0x885   : > { %908 = vst.msk [vmem:[%s2492_s16 + $0xf] sm:$0x1] %vm755_vm9, %v892_v15 }
 0x888   : > { %v912_v19 = vpop.permute.xlu1 %911 }
 0x889   : > { %934 = vst.msk [vmem:[%s2499_s23 + $0x3] sm:$0x1] %vm755_vm9, %v912_v19 }
 0x88c   : > { %v916_v20 = vpop.permute.xlu1 %915 }
 0x88d   : > { %936 = vst.msk [vmem:[%s2499_s23 + $0x7] sm:$0x1] %vm755_vm9, %v916_v20 }
 0x890   : > { %v920_v21 = vpop.permute.xlu1 %919 }
 0x891   : > { %938 = vst.msk [vmem:[%s2499_s23 + $0xb] sm:$0x1] %vm755_vm9, %v920_v21 }
 0x894   : > { %v924_v22 = vpop.permute.xlu1 %923 }
 0x895   : > { %940 = vst.msk [vmem:[%s2499_s23 + $0xf] sm:$0x1] %vm755_vm9, %v924_v22  ;;  %s2076_s23 = scalar_lea.vmem %s2700_s19, 128 }
 0x896   : > { %p2077_p11 = scmp.ne.s32.totalorder %s2700_s19, %s2076_s23  ;;  %p2084_p1 = scmp.lt.s32.totalorder %s2082_s25, %s2076_s23 }
 0x898   : > { %p2078_p12 = pnand %p2077_p11, %p2266_p5  ;;  %p2085_p2 = por %p2084_p1, %p2083_p0 }
 0x89a   : > { %p2079_p13 = pneg %p2078_p12 }
 0x89c   : > { %p2086_p3 = pnand %p2085_p2, %p2079_p13 }
 0x906   : > { %v1641_v23 = vpop.f32.mrf.mxu1 }
 0x907   : > { %v1647_v24 = vadd.f32 %v1641_v23, %v2392_v60 }
 0x908   : > { %v1643_v25 = vpop.f32.mrf.mxu1 }
 0x909   : > { %1648 = vst.msk [vmem:[%s489_s28] sm:$0xff] %vm531_vm0, %v1647_v24 }
 0x90a   : > { %v1644_v26 = vpop.f32.mrf.mxu1 }
 0x90b   : > { %2089 = shalt.err (!%p2086_p3)
}
 0x90c   : > { %s2090_s3 = scalar_lea.hbm %s2698_s0, 128  ;;  %s2094_s26 = scalar_lea.hbm %s2752_s12, 256 }
 0x90d   : > { %p2091_p4 = scmp.ne.s32.totalorder %s2698_s0, %s2090_s3  ;;  %p2095_p9 = scmp.lt.s32.totalorder %s2698_s0, %s2752_s12 }
 0x90e   : > { %p2096_p10 = scmp.lt.s32.totalorder %s2094_s26, %s2090_s3 }
 0x90f   : > { %p2092_p7 = pnand %p2091_p4, %p2266_p5 }
 0x910   : > { %p2097_p11 = por %p2096_p10, %p2095_p9 }
 0x911   : > { %p2093_p8 = pneg %p2092_p7 }
 0x913   : > { %p2098_p12 = pnand %p2097_p11, %p2093_p8 }
 0x915   : > { %2101 = shalt.err (!%p2098_p12)
}
 0x916   : > { %1954 = dma.vmem_to_hbm [thread:$0]  (%p2266_p5), %s2700_s19, 128, %s2698_s0, %s1650_s11   ;;  %v1645_v60 = vpop.f32.mrf.mxu1 }
 0x917 PF: > { %p1960_p13 = scmp.ge.s32.totalorder %s2136_s10, 2  ;;  %s1691_s16 = sand.u32 1, %s2124_s29  }
 0x918   : > { %s1692_s27 = scalar_lea.sflag [#allocation3], %s1691_s16 }
 0x919   : > { %p1957_p0 = pnand %p1960_p13, %p2270_p6 }
 0x91b   : > { %p1958_p1 = pneg %p1957_p0 }
 0x91d   : > { %2119 = dma.done.wait (%p1958_p1), %s1692_s27, 128  }
 0x91e   : > { %2121 = vsyncadd (%p1958_p1), %s1692_s27, 4294967168  ;;  %p25_p2 = scmp.ge.s32.totalorder %s2253_s17, 4   ;;  %s2779_s29 = smov %s2128_s30 }
 0x91f   : > { %s2780_s30 = smov %s2132_s15  ;;  %s2781_s15 = smov %s2264_s20 }
 0x920   : > { %s2782_s10 = smov %s2253_s17  ;;  %27 = sbr.rel (!%p25_p2) target bundleno = 9 (0x9), region = 133 }
 0x925   :  { %1713 = vsyncpa [#allocation3], 1 }
 0x926   :  { %1715 = vsyncpa [#allocation3 + $0x1], 1 }

</bundles_post_ra>
